<compile_context>
chip_gen: v7x
topology: tpu7x:2x2x1
jax: 0.10.0
libtpu: 0.0.40
codegen_flags: <defaults>
</compile_context>

<pallas_src>
import math
from functools import partial

import jax
import jax.numpy as jnp
from jax.experimental import pallas as pl
from jax.experimental.pallas import tpu as pltpu

EPS = 1e-15          # geoopt's clamp_min for norms / denominators
ATANH_EPS = 1e-6     # artanh domain clamp (f32)

HIDDEN = 768
PROBE_DIM = 64
OUT_LANES = 128      # lane-dense output slab width


def _artanh(x):
    x = jnp.clip(x, 0.0, 1.0 - ATANH_EPS)
    return 0.5 * (jnp.log(1.0 + x) - jnp.log(1.0 - x))


def _expmap0_host(u):
    # Poincare ball (k = -1): expmap0(u) = tanh(||u||) * u / ||u||  (host-side helper)
    n = jnp.maximum(jnp.sqrt(jnp.sum(u * u, axis=-1, keepdims=True)), EPS)
    return jnp.tanh(n) * u / n


def _poincare_probe_kernel(x_ref, w_ref, xm_ref, x2_ref, seg_ref, out_ref, *, total_rows):
    # x_ref:   (N, H)      N = Bt*S rows of this grid step (Bt whole batch elements)
    # w_ref:   (H, P) bf16 resident folded weight, P = 128 (zero-padded probe dim)
    # xm_ref:  (P, 2) f32  col 0 = -pos, col 1 = -neg (zero-padded)
    # x2_ref:  (8, 128) f32  [0,0] = ||pos||^2, [0,1] = ||neg||^2
    # seg_ref: (Bt, N) f32 resident segment-sum matrix (row b sums rows [b*S,(b+1)*S))
    # out_ref: (Bt, 128)   lane 0 = neg_logits, lane 1 = pos_logits
    N = x_ref.shape[0]

    x = x_ref[...]
    if x.dtype != jnp.bfloat16:
        x = x.astype(jnp.bfloat16)       # in-VMEM cast: fast MXU path, no extra HBM pass
    w = w_ref[...]                       # (H, P) bf16
    xm = xm_ref[...]                     # (P, 2)
    x2 = x2_ref[0:1, 0:2]                # (1, 2): ||pos||^2, ||neg||^2
    seg = seg_ref[...]                   # (Bt, N)

    # 1) single MXU matmul (trans folded into proj): m0 = x @ (proj @ trans.T)
    m0 = jnp.dot(x, w, preferred_element_type=jnp.float32)            # (N, P) f32

    # 2) expmap0 collapsed to per-row scalars: t = tanh(r)/r * m0, r = ||m0||, ||t|| = tanh(r)
    r2 = jnp.sum(m0 * m0, axis=-1, keepdims=True)                     # (N, 1) only wide VPU+XLU op
    r = jnp.maximum(jnp.sqrt(r2), EPS)
    th = jnp.tanh(r)
    scale = th / r                                                    # tanh(r)/r -> 1 as r -> 0
    t2 = th * th                                                      # ||t||^2

    # 3) <-p, t> for both base points in one narrow MXU matmul (t never materialized)
    xy = scale * jnp.dot(m0, xm, preferred_element_type=jnp.float32)  # (N, 2)

    # 4) Poincare distance, fully per-row:
    #    ma = mobius_add(-p, t);  ||ma|| = sqrt(A^2*x2 + 2*A*B*xy + B^2*t2) / den
    c = 1.0 + 2.0 * xy                                                # (N, 2)
    a = c + t2                                                        # (N, 2)
    b = 1.0 - x2                                                      # (1, 2)
    den = jnp.maximum(c + x2 * t2, EPS)                               # (N, 2)
    num2 = (a * a) * x2 + (2.0 * b) * (a * xy) + (b * b) * t2         # (N, 2) == ||num||^2
    ma_norm = jnp.sqrt(jnp.maximum(num2, 0.0)) / den
    dist = 2.0 * _artanh(ma_norm)                # (N, 2): col 0 -> neg_logits, col 1 -> pos_logits

    # rows of the (optional) partial last tile read unspecified HBM -> zero them before mixing
    if total_rows is not None:
        row = pl.program_id(0) * N + jax.lax.broadcasted_iota(jnp.int32, dist.shape, 0)
        dist = jnp.where(row < total_rows, dist, 0.0)

    # 5) both per-batch sequence sums with one MXU matmul against the hoisted segment mask
    sums = jnp.dot(seg, dist, preferred_element_type=jnp.float32)     # (Bt, 2)

    # lane-dense output slab: lane 0 = neg_logits, lane 1 = pos_logits
    lane = jax.lax.broadcasted_iota(jnp.int32, out_ref.shape, 1)
    out_ref[...] = jnp.where(lane == 0, sums[:, 0:1],
                             jnp.where(lane == 1, sums[:, 1:2], 0.0))


def _normalize_bt(B, S, bt):
    """Clamp/round a batch-tile size so every BlockSpec satisfies TPU tiling constraints."""
    bt = max(1, min(int(bt), B))
    if bt >= B:
        return B                           # single tile: blocks equal the full array dims
    bt = max(8, (bt // 8) * 8)             # output block needs a multiple-of-8 sublane dim
    if (bt * S) % 16 != 0:                 # bf16 x tiles need a multiple-of-16 sublane dim
        bt = max(16, (bt // 16) * 16)
    return B if bt >= B else bt


def _choose_bt(B, S):
    """Batch elements per grid step (~2K rows per x tile; resident seg matrix <= 4 MiB)."""
    target_rows = 2048
    bt = max(1, target_rows // max(S, 1))
    seg_cap = max(1, int((1048576 // max(S, 1)) ** 0.5))
    bt = min(bt, seg_cap)
    if B // 4 >= 8:                        # >= 4 grid steps for v7x's two TensorCores
        bt = min(bt, B // 4)
    return _normalize_bt(B, S, bt)


@partial(jax.jit, static_argnames=("block_batch",))
def poincare_probe_forward(sequence_output, proj, trans, pos, neg, block_batch=None):
    B, S, H = sequence_output.shape
    P = proj.shape[1]
    P_pad = ((P + 127) // 128) * 128       # pad probe dim to full lane width (64 -> 128)

    # Fold trans into proj: mobius_matvec(M, expmap0(u)) == expmap0(M u) at curvature -1.
    w = jnp.dot(proj.astype(jnp.float32), trans.astype(jnp.float32).T,
                precision=jax.lax.Precision.HIGHEST)                              # (H, P)
    w_pad = jnp.zeros((H, P_pad), jnp.float32).at[:, :P].set(w).astype(jnp.bfloat16)

    pos32 = pos.reshape(-1).astype(jnp.float32)
    neg32 = neg.reshape(-1).astype(jnp.float32)
    xm = jnp.zeros((P_pad, 2), jnp.float32)
    xm = xm.at[:P, 0].set(-pos32).at[:P, 1].set(-neg32)                # columns: -pos, -neg
    x2_pad = jnp.zeros((8, 128), jnp.float32)
    x2_pad = x2_pad.at[0, 0].set(jnp.sum(pos32 * pos32)).at[0, 1].set(jnp.sum(neg32 * neg32))

    Bt = _normalize_bt(B, S, block_batch) if block_batch is not None else _choose_bt(B, S)
    N = Bt * S
    G = (B + Bt - 1) // Bt
    total_rows = B * S

    # No wrapper-side astype / pad of x (each would be an extra HBM pass): stream it as-is.
    x2d = sequence_output.reshape(total_rows, H)

    # Segment-sum matrix depends only on (Bt, S) -> hoisted out of the grid body, resident.
    rows = jnp.arange(Bt, dtype=jnp.int32)[:, None]
    cols = jnp.arange(N, dtype=jnp.int32)[None, :]
    seg = ((cols >= rows * S) & (cols < (rows + 1) * S)).astype(jnp.float32)       # (Bt, N)

    kernel = partial(_poincare_probe_kernel,
                     total_rows=total_rows if G * N != total_rows else None)

    out = pl.pallas_call(
        kernel,
        grid=(G,),
        in_specs=[
            pl.BlockSpec((N, H), lambda i: (i, 0)),          # streamed x tile
            pl.BlockSpec((H, P_pad), lambda i: (0, 0)),      # resident folded weight (bf16)
            pl.BlockSpec((P_pad, 2), lambda i: (0, 0)),      # resident [-pos | -neg]
            pl.BlockSpec((8, 128), lambda i: (0, 0)),        # ||pos||^2, ||neg||^2
            pl.BlockSpec((Bt, N), lambda i: (0, 0)),         # resident segment-sum matrix
        ],
        out_specs=pl.BlockSpec((Bt, OUT_LANES), lambda i: (i, 0)),
        out_shape=jax.ShapeDtypeStruct((G * Bt, OUT_LANES), jnp.float32),
        compiler_params=pltpu.CompilerParams(
            dimension_semantics=("parallel",),
            vmem_limit_bytes=40 * 1024 * 1024,   # fits v7x's 64 MiB physical VMEM with headroom
        ),
    )(x2d, w_pad, xm, x2_pad, seg)

    return out[:B, :2]                           # (B, 2): [:, 0] = neg_logits, [:, 1] = pos_logits


def reference_forward(sequence_output, proj, trans, pos, neg):
    # Pure-JAX mirror of the PyTorch/geoopt forward (non-folded composition) for validation.
    hi = jax.lax.Precision.HIGHEST
    u = jnp.einsum("bsh,hp->bsp", sequence_output, proj, precision=hi)
    y = _expmap0_host(u)
    y_norm = jnp.maximum(jnp.sqrt(jnp.sum(y * y, -1, keepdims=True)), EPS)
    mx = jnp.einsum("bsp,qp->bsq", y, trans, precision=hi)   # y @ trans.T
    mx_norm = jnp.sqrt(jnp.sum(mx * mx, -1, keepdims=True))
    res = jnp.tanh(mx_norm / y_norm * _artanh(y_norm)) * mx / jnp.maximum(mx_norm, EPS)
    t = jnp.where(mx_norm == 0.0, 0.0, res)

    def dist(p):
        xmv = -p
        x2 = jnp.sum(xmv * xmv, -1, keepdims=True)
        t2 = jnp.sum(t * t, -1, keepdims=True)
        xy = jnp.sum(xmv * t, -1, keepdims=True)
        num = (1.0 + 2.0 * xy + t2) * xmv + (1.0 - x2) * t
        den = jnp.maximum(1.0 + 2.0 * xy + x2 * t2, EPS)
        ma = num / den
        return 2.0 * _artanh(jnp.sqrt(jnp.sum(ma * ma, -1)))

    pos_logits = dist(neg).sum(-1)
    neg_logits = dist(pos).sum(-1)
    return jnp.stack((neg_logits, pos_logits), axis=-1)


if __name__ == "__main__":
    B, S = 12, 8        # small shapes; block_batch=8 exercises a 2-step grid + partial last tile
    key = jax.random.PRNGKey(0)
    k_proj, k_trans, k_x = jax.random.split(key, 3)

    # Deterministic parameter init (module: uniform(-0.05, 0.05) for proj and trans).
    proj = jax.random.uniform(k_proj, (HIDDEN, PROBE_DIM), jnp.float32, -0.05, 0.05)
    trans = jax.random.uniform(k_trans, (PROBE_DIM, PROBE_DIM), jnp.float32, -0.05, 0.05)

    bound = 0.5 / math.sqrt(PROBE_DIM)
    pos = _expmap0_host(jnp.ones((PROBE_DIM,), jnp.float32) * bound)
    neg = _expmap0_host(jnp.ones((PROBE_DIM,), jnp.float32) * (-bound))

    sequence_output = 0.1 * jax.random.normal(k_x, (B, S, HIDDEN), jnp.float32)

    # default tiling (single full tile) and forced 2-step grid with a partial last tile
    out = jax.block_until_ready(
        poincare_probe_forward(sequence_output, proj, trans, pos, neg))
    out_tiled = jax.block_until_ready(
        poincare_probe_forward(sequence_output, proj, trans, pos, neg, block_batch=8))

    ref = reference_forward(
        sequence_output, proj, trans, pos.reshape(1, PROBE_DIM), neg.reshape(1, PROBE_DIM))

    assert out.shape == (B, 2), out.shape
    assert bool(jnp.all(jnp.isfinite(out))), out
    assert jnp.allclose(out, out_tiled, rtol=1e-4, atol=1e-4), (out, out_tiled)
    # bf16-fed MXU vs f32 HIGHEST reference -> loose tolerance; see float64 TODO above.
    assert jnp.allclose(out, ref, rtol=2e-2, atol=2e-2), (out, ref)
    print("KERNEL_OK")
</pallas_src>

<mosaic_0001>
module attributes {stable_mosaic.version = 11 : i64} {
  func.func @_poincare_probe_kernel(%arg0: i32, %arg1: memref<96x768xf32, #tpu.memory_space<vmem>>, %arg2: memref<768x128xbf16, #tpu.memory_space<vmem>>, %arg3: memref<128x2xf32, #tpu.memory_space<vmem>>, %arg4: memref<8x128xf32, #tpu.memory_space<vmem>>, %arg5: memref<12x96xf32, #tpu.memory_space<vmem>>, %arg6: memref<12x128xf32, #tpu.memory_space<vmem>>) attributes {dimension_semantics = [#tpu.dimension_semantics<parallel>], iteration_bounds = array<i64: 1>, scalar_prefetch = 0 : i64, scratch_operands = 0 : i64, tpu.core_type = #tpu.core_type<tc>, window_params = [{transform_indices = @transform_0, window_bounds = array<i64: 96, 768>}, {pipeline_mode = #tpu.pipeline_mode<synchronous>, transform_indices = @transform_1, window_bounds = array<i64: 768, 128>}, {pipeline_mode = #tpu.pipeline_mode<synchronous>, transform_indices = @transform_2, window_bounds = array<i64: 128, 2>}, {pipeline_mode = #tpu.pipeline_mode<synchronous>, transform_indices = @transform_3, window_bounds = array<i64: 8, 128>}, {pipeline_mode = #tpu.pipeline_mode<synchronous>, transform_indices = @transform_4, window_bounds = array<i64: 12, 96>}, {transform_indices = @transform_5, window_bounds = array<i64: 12, 128>}]} {
    %c0 = arith.constant 0 : index
    %c0_0 = arith.constant 0 : index
    %0 = vector.load %arg1[%c0, %c0_0] : memref<96x768xf32, #tpu.memory_space<vmem>>, vector<96x768xf32>
    %1 = arith.truncf %0 : vector<96x768xf32> to vector<96x768xbf16>
    %c0_1 = arith.constant 0 : index
    %c0_2 = arith.constant 0 : index
    %2 = vector.load %arg2[%c0_1, %c0_2] : memref<768x128xbf16, #tpu.memory_space<vmem>>, vector<768x128xbf16>
    %c0_3 = arith.constant 0 : index
    %c0_4 = arith.constant 0 : index
    %3 = vector.load %arg3[%c0_3, %c0_4] : memref<128x2xf32, #tpu.memory_space<vmem>>, vector<128x2xf32>
    %c0_5 = arith.constant 0 : index
    %c0_6 = arith.constant 0 : index
    %4 = vector.load %arg4[%c0_5, %c0_6] : memref<8x128xf32, #tpu.memory_space<vmem>>, vector<1x2xf32>
    %c0_7 = arith.constant 0 : index
    %c0_8 = arith.constant 0 : index
    %5 = vector.load %arg5[%c0_7, %c0_8] : memref<12x96xf32, #tpu.memory_space<vmem>>, vector<12x96xf32>
    %cst = arith.constant dense<0.000000e+00> : vector<96x128xf32>
    %6 = tpu.matmul %1, %2, %cst {dimension_numbers = #tpu.dot_dimension_numbers<[1], [0], [0], [1], [0, 0, 1, 1], [], []>} : vector<96x768xbf16>, vector<768x128xbf16>, vector<96x128xf32> -> vector<96x128xf32>
    %7 = arith.mulf %6, %6 : vector<96x128xf32>
    %cst_9 = arith.constant dense<0.000000e+00> : vector<96xf32>
    %8 = vector.multi_reduction <add>, %7, %cst_9 [1] : vector<96x128xf32> to vector<96xf32>
    %9 = vector.shape_cast %8 : vector<96xf32> to vector<96x1xf32>
    %10 = math.sqrt %9 : vector<96x1xf32>
    %cst_10 = arith.constant 1.000000e-15 : f32
    %11 = vector.broadcast %cst_10 : f32 to vector<96x1xf32>
    %12 = arith.maximumf %10, %11 : vector<96x1xf32>
    %13 = math.tanh %12 : vector<96x1xf32>
    %14 = arith.divf %13, %12 : vector<96x1xf32>
    %15 = arith.mulf %13, %13 : vector<96x1xf32>
    %cst_11 = arith.constant dense<0.000000e+00> : vector<96x2xf32>
    %16 = tpu.matmul %6, %3, %cst_11 {dimension_numbers = #tpu.dot_dimension_numbers<[1], [0], [0], [1], [0, 0, 1, 1], [], []>} : vector<96x128xf32>, vector<128x2xf32>, vector<96x2xf32> -> vector<96x2xf32>
    %17 = vector.broadcast %14 : vector<96x1xf32> to vector<96x2xf32>
    %18 = arith.mulf %17, %16 : vector<96x2xf32>
    %cst_12 = arith.constant 2.000000e+00 : f32
    %19 = vector.broadcast %cst_12 : f32 to vector<96x2xf32>
    %20 = arith.mulf %19, %18 : vector<96x2xf32>
    %cst_13 = arith.constant 1.000000e+00 : f32
    %21 = vector.broadcast %cst_13 : f32 to vector<96x2xf32>
    %22 = arith.addf %21, %20 : vector<96x2xf32>
    %23 = vector.broadcast %15 : vector<96x1xf32> to vector<96x2xf32>
    %24 = arith.addf %22, %23 : vector<96x2xf32>
    %cst_14 = arith.constant 1.000000e+00 : f32
    %25 = vector.broadcast %cst_14 : f32 to vector<1x2xf32>
    %26 = arith.subf %25, %4 : vector<1x2xf32>
    %27 = vector.broadcast %4 : vector<1x2xf32> to vector<96x2xf32>
    %28 = vector.broadcast %15 : vector<96x1xf32> to vector<96x2xf32>
    %29 = arith.mulf %27, %28 : vector<96x2xf32>
    %30 = arith.addf %22, %29 : vector<96x2xf32>
    %cst_15 = arith.constant 1.000000e-15 : f32
    %31 = vector.broadcast %cst_15 : f32 to vector<96x2xf32>
    %32 = arith.maximumf %30, %31 : vector<96x2xf32>
    %33 = arith.mulf %24, %24 : vector<96x2xf32>
    %34 = vector.broadcast %4 : vector<1x2xf32> to vector<96x2xf32>
    %35 = arith.mulf %33, %34 : vector<96x2xf32>
    %cst_16 = arith.constant 2.000000e+00 : f32
    %36 = vector.broadcast %cst_16 : f32 to vector<1x2xf32>
    %37 = arith.mulf %36, %26 : vector<1x2xf32>
    %38 = arith.mulf %24, %18 : vector<96x2xf32>
    %39 = vector.broadcast %37 : vector<1x2xf32> to vector<96x2xf32>
    %40 = arith.mulf %39, %38 : vector<96x2xf32>
    %41 = arith.addf %35, %40 : vector<96x2xf32>
    %42 = arith.mulf %26, %26 : vector<1x2xf32>
    %43 = vector.broadcast %42 : vector<1x2xf32> to vector<96x2xf32>
    %44 = vector.broadcast %15 : vector<96x1xf32> to vector<96x2xf32>
    %45 = arith.mulf %43, %44 : vector<96x2xf32>
    %46 = arith.addf %41, %45 : vector<96x2xf32>
    %cst_17 = arith.constant 0.000000e+00 : f32
    %47 = vector.broadcast %cst_17 : f32 to vector<96x2xf32>
    %48 = arith.maximumf %46, %47 : vector<96x2xf32>
    %49 = math.sqrt %48 : vector<96x2xf32>
    %50 = arith.divf %49, %32 : vector<96x2xf32>
    %cst_18 = arith.constant 0.000000e+00 : f32
    %cst_19 = arith.constant 0.999998986 : f32
    %51 = vector.broadcast %cst_18 : f32 to vector<96x2xf32>
    %52 = arith.maximumf %51, %50 : vector<96x2xf32>
    %53 = vector.broadcast %cst_19 : f32 to vector<96x2xf32>
    %54 = arith.minimumf %53, %52 : vector<96x2xf32>
    %cst_20 = arith.constant 1.000000e+00 : f32
    %55 = vector.broadcast %cst_20 : f32 to vector<96x2xf32>
    %56 = arith.addf %55, %54 : vector<96x2xf32>
    %57 = math.log %56 : vector<96x2xf32>
    %cst_21 = arith.constant 1.000000e+00 : f32
    %58 = vector.broadcast %cst_21 : f32 to vector<96x2xf32>
    %59 = arith.subf %58, %54 : vector<96x2xf32>
    %60 = math.log %59 : vector<96x2xf32>
    %61 = arith.subf %57, %60 : vector<96x2xf32>
    %cst_22 = arith.constant 5.000000e-01 : f32
    %62 = vector.broadcast %cst_22 : f32 to vector<96x2xf32>
    %63 = arith.mulf %62, %61 : vector<96x2xf32>
    %cst_23 = arith.constant 2.000000e+00 : f32
    %64 = vector.broadcast %cst_23 : f32 to vector<96x2xf32>
    %65 = arith.mulf %64, %63 : vector<96x2xf32>
    %cst_24 = arith.constant dense<0.000000e+00> : vector<12x2xf32>
    %66 = tpu.matmul %5, %65, %cst_24 {dimension_numbers = #tpu.dot_dimension_numbers<[1], [0], [0], [1], [0, 0, 1, 1], [], []>} : vector<12x96xf32>, vector<96x2xf32>, vector<12x2xf32> -> vector<12x2xf32>
    %67 = tpu.iota {dimensions = array<i32: 1>} : vector<12x128xi32>
    %c0_i32 = arith.constant 0 : i32
    %68 = vector.broadcast %c0_i32 : i32 to vector<12x128xi32>
    %69 = arith.cmpi eq, %67, %68 : vector<12x128xi32>
    %70 = vector.extract_strided_slice %66 {offsets = [0, 0], sizes = [12, 1], strides = [1, 1]} : vector<12x2xf32> to vector<12x1xf32>
    %c1_i32 = arith.constant 1 : i32
    %71 = vector.broadcast %c1_i32 : i32 to vector<12x128xi32>
    %72 = arith.cmpi eq, %67, %71 : vector<12x128xi32>
    %73 = vector.extract_strided_slice %66 {offsets = [0, 1], sizes = [12, 1], strides = [1, 1]} : vector<12x2xf32> to vector<12x1xf32>
    %cst_25 = arith.constant 0.000000e+00 : f32
    %74 = vector.shape_cast %73 : vector<12x1xf32> to vector<12x1xf32>
    %75 = vector.broadcast %74 : vector<12x1xf32> to vector<12x128xf32>
    %76 = vector.broadcast %cst_25 : f32 to vector<12x128xf32>
    %77 = arith.select %72, %75, %76 : vector<12x128xi1>, vector<12x128xf32>
    %78 = vector.shape_cast %70 : vector<12x1xf32> to vector<12x1xf32>
    %79 = vector.broadcast %78 : vector<12x1xf32> to vector<12x128xf32>
    %80 = arith.select %69, %79, %77 : vector<12x128xi1>, vector<12x128xf32>
    %c0_26 = arith.constant 0 : index
    %c0_27 = arith.constant 0 : index
    %81 = vector.load %arg6[%c0_26, %c0_27] : memref<12x128xf32, #tpu.memory_space<vmem>>, vector<12x128xf32>
    tpu.vector_store %arg6[%c0_26, %c0_27], %80 {strides = array<i32>} : memref<12x128xf32, #tpu.memory_space<vmem>>, vector<12x128xf32>,
    return
  }
  func.func @transform_0(%arg0: i32) -> (i32, i32) {
    %c0_i32 = arith.constant 0 : i32
    %c0_i32_0 = arith.constant 0 : i32
    return %arg0, %c0_i32 : i32, i32
  }
  func.func @transform_1(%arg0: i32) -> (i32, i32) {
    %c0_i32 = arith.constant 0 : i32
    %c0_i32_0 = arith.constant 0 : i32
    %c0_i32_1 = arith.constant 0 : i32
    return %c0_i32, %c0_i32_0 : i32, i32
  }
  func.func @transform_2(%arg0: i32) -> (i32, i32) {
    %c0_i32 = arith.constant 0 : i32
    %c0_i32_0 = arith.constant 0 : i32
    %c0_i32_1 = arith.constant 0 : i32
    return %c0_i32, %c0_i32_0 : i32, i32
  }
  func.func @transform_3(%arg0: i32) -> (i32, i32) {
    %c0_i32 = arith.constant 0 : i32
    %c0_i32_0 = arith.constant 0 : i32
    %c0_i32_1 = arith.constant 0 : i32
    return %c0_i32, %c0_i32_0 : i32, i32
  }
  func.func @transform_4(%arg0: i32) -> (i32, i32) {
    %c0_i32 = arith.constant 0 : i32
    %c0_i32_0 = arith.constant 0 : i32
    %c0_i32_1 = arith.constant 0 : i32
    return %c0_i32, %c0_i32_0 : i32, i32
  }
  func.func @transform_5(%arg0: i32) -> (i32, i32) {
    %c0_i32 = arith.constant 0 : i32
    %c0_i32_0 = arith.constant 0 : i32
    return %arg0, %c0_i32 : i32, i32
  }
}

</mosaic_0001>

<bundles_post_ra>
// kernel: poincare_probe_forward.1
= control target key start
LH: loop header
LB: loop body
LE: loop exit
PB: predicated region body
PF: predicated region fallthrough
CT: control target
= control target key end

     0   :  { %s3217_s1 = inlined_call_operand.vmem [shape: bf16[768,128], index: 1, kind: input, shape index: {}]   ;;  %s3218_s0 = inlined_call_operand.vmem [shape: f32[96,768], index: 0, kind: input, shape index: {}]   ;;  %s3219_s2 = inlined_call_operand.vmem [shape: f32[128,2], index: 2, kind: input, shape index: {}]   ;;  %s3220_s3 = inlined_call_operand.vmem [shape: f32[8,128], index: 3, kind: input, shape index: {}]   ;;  %s3221_s4 = inlined_call_operand.vmem [shape: f32[12,96], index: 4, kind: input, shape index: {}]   ;;  %s3222_s5 = inlined_call_operand.vmem [shape: f32[12,128], index: 5, kind: output, shape index: {}]  }
   0x1   :  { %v2016_v0 = vld [vmem:[%s3217_s1 + $0x40] sm:$0xff]   ;;  %v2020_v4 = vld [vmem:[%s3217_s1 + $0x48] sm:$0xff]   ;;  %v2024_v8 = vld [vmem:[%s3217_s1 + $0x50] sm:$0xff]  }
   0x2   :  { %v2017_v1 = vld [vmem:[%s3217_s1 + $0xc0] sm:$0xff]   ;;  %1679 = vmatprep.subr.bf16.mxu0 %v2016_v0  ;;  %v2021_v5 = vld [vmem:[%s3217_s1 + $0xc8] sm:$0xff]   ;;  %v2025_v9 = vld [vmem:[%s3217_s1 + $0xd0] sm:$0xff]  }
   0x3   :  { %v2018_v2 = vld [vmem:[%s3217_s1] sm:$0xff]   ;;  %1731 = vmatprep.subr.bf16.mxu1 %v2017_v1  ;;  %v2022_v6 = vld [vmem:[%s3217_s1 + $0x8] sm:$0xff]   ;;  %v2026_v10 = vld [vmem:[%s3217_s1 + $0x10] sm:$0xff]  }
   0x4   :  { %v2019_v3 = vld [vmem:[%s3217_s1 + $0x80] sm:$0xff]   ;;  %1680 = vmatpush3.bf16.msra.mxu0 %v2018_v2  ;;  %v2023_v7 = vld [vmem:[%s3217_s1 + $0x88] sm:$0xff]   ;;  %v2027_v11 = vld [vmem:[%s3217_s1 + $0x90] sm:$0xff]  }
   0x5   :  { %1732 = vmatpush3.bf16.msra.mxu1 %v2019_v3  ;;  %1681 = vmatprep.subr.bf16.mxu0 %v2020_v4  ;;  %v2028_v12 = vld [vmem:[%s3217_s1 + $0x58] sm:$0xff]   ;;  %v2032_v16 = vld [vmem:[%s3217_s1 + $0x60] sm:$0xff]   ;;  %v2036_v20 = vld [vmem:[%s3217_s1 + $0x68] sm:$0xff]  }
   0x6   :  { %1733 = vmatprep.subr.bf16.mxu1 %v2021_v5  ;;  %v2029_v13 = vld [vmem:[%s3217_s1 + $0xd8] sm:$0xff]   ;;  %v2033_v17 = vld [vmem:[%s3217_s1 + $0xe0] sm:$0xff]   ;;  %v2037_v21 = vld [vmem:[%s3217_s1 + $0xe8] sm:$0xff]  }
   0x7   :  { %v2030_v14 = vld [vmem:[%s3217_s1 + $0x18] sm:$0xff]   ;;  %v2034_v18 = vld [vmem:[%s3217_s1 + $0x20] sm:$0xff]   ;;  %v2038_v22 = vld [vmem:[%s3217_s1 + $0x28] sm:$0xff]  }
   0x8   :  { %1682 = vmatpush3.bf16.msra.mxu0 %v2022_v6  ;;  %v2031_v15 = vld [vmem:[%s3217_s1 + $0x98] sm:$0xff]   ;;  %v2035_v19 = vld [vmem:[%s3217_s1 + $0xa0] sm:$0xff]   ;;  %v2039_v23 = vld [vmem:[%s3217_s1 + $0xa8] sm:$0xff]  }
   0x9   :  { %1734 = vmatpush3.bf16.msra.mxu1 %v2023_v7  ;;  %1683 = vmatprep.subr.bf16.mxu0 %v2024_v8  ;;  %v2040_v24 = vld [vmem:[%s3217_s1 + $0x70] sm:$0xff]   ;;  %v2044_v28 = vld [vmem:[%s3217_s1 + $0x78] sm:$0xff]   ;;  %v22_v32 = vld [vmem:[%s3218_s0 + $0x8] sm:$0xff] }
   0xa   :  { %1735 = vmatprep.subr.bf16.mxu1 %v2025_v9  ;;  %v2041_v25 = vld [vmem:[%s3217_s1 + $0xf0] sm:$0xff]   ;;  %v2045_v29 = vld [vmem:[%s3217_s1 + $0xf8] sm:$0xff]   ;;  %v30_v36 = vld [vmem:[%s3218_s0 + $0x48] sm:$0xff] }
   0xb   :  { %v2042_v26 = vld [vmem:[%s3217_s1 + $0x30] sm:$0xff]   ;;  %v2046_v30 = vld [vmem:[%s3217_s1 + $0x38] sm:$0xff]   ;;  %v21_v37 = vld [vmem:[%s3218_s0] sm:$0xff] }
   0xc   :  { %1684 = vmatpush3.bf16.msra.mxu0 %v2026_v10  ;;  %v2043_v27 = vld [vmem:[%s3217_s1 + $0xb0] sm:$0xff]   ;;  %v2047_v31 = vld [vmem:[%s3217_s1 + $0xb8] sm:$0xff]   ;;  %v29_v42 = vld [vmem:[%s3218_s0 + $0x40] sm:$0xff] }
   0xd   :  { %1736 = vmatpush3.bf16.msra.mxu1 %v2027_v11  ;;  %1685 = vmatprep.subr.bf16.mxu0 %v2028_v12  ;;  %v28_v33 = vld [vmem:[%s3218_s0 + $0x38] sm:$0xff]  ;;  %v27_v38 = vld [vmem:[%s3218_s0 + $0x30] sm:$0xff]  ;;  %v2048_v44 = vld [vmem:[%s3217_s1 + $0x140] sm:$0xff]  }
   0xe   :  { %1737 = vmatprep.subr.bf16.mxu1 %v2029_v13  ;;  %v24_v34 = vld [vmem:[%s3218_s0 + $0x18] sm:$0xff]  ;;  %v94_v35 = vpack.c.bf16 %v28_v33, %v22_v32  ;;  %v93_v40 = vpack.c.bf16 %v27_v38, %v21_v37  ;;  %v23_v41 = vld [vmem:[%s3218_s0 + $0x10] sm:$0xff]  ;;  %v2049_v45 = vld [vmem:[%s3217_s1 + $0x100] sm:$0xff]  }
   0xf   :  { %v96_v39 = vpack.c.bf16 %v30_v36, %v24_v34  ;;  %v95_v43 = vpack.c.bf16 %v29_v42, %v23_v41  ;;  %v2050_v46 = vld [vmem:[%s3217_s1 + $0x148] sm:$0xff]   ;;  %v40_v48 = vld [vmem:[%s3218_s0 + $0x98] sm:$0xff]  ;;  %v33_v54 = vld [vmem:[%s3218_s0 + $0x60] sm:$0xff] }
  0x10   :  { %1686 = vmatpush3.bf16.msra.mxu0 %v2030_v14  ;;  %564 = vmatprep.mubr.bf16.mxu0 %v94_v35  ;;  %v34_v47 = vld [vmem:[%s3218_s0 + $0x68] sm:$0xff]  ;;  %v36_v49 = vld [vmem:[%s3218_s0 + $0x78] sm:$0xff]  ;;  %v39_v55 = vld [vmem:[%s3218_s0 + $0x90] sm:$0xff] }
  0x11   :  { %1738 = vmatpush3.bf16.msra.mxu1 %v2031_v15  ;;  %1687 = vmatprep.subr.bf16.mxu0 %v2032_v16  ;;  %v42_v50 = vld [vmem:[%s3218_s0 + $0xa8] sm:$0xff]  ;;  %v100_v51 = vpack.c.bf16 %v40_v48, %v34_v47  ;;  %v35_v56 = vld [vmem:[%s3218_s0 + $0x70] sm:$0xff]  ;;  %v99_v57 = vpack.c.bf16 %v39_v55, %v33_v54  ;;  %v41_v58 = vld [vmem:[%s3218_s0 + $0xa0] sm:$0xff] }
  0x12   :  { %1739 = vmatprep.subr.bf16.mxu1 %v2033_v17  ;;  %645 = vmatprep.mubr.bf16.mxu1 %v96_v39  ;;  %v102_v52 = vpack.c.bf16 %v42_v50, %v36_v49  ;;  %v2051_v53 = vld [vmem:[%s3217_s1 + $0x108] sm:$0xff]   ;;  %v101_v59 = vpack.c.bf16 %v41_v58, %v35_v56  ;;  %v2052_v60 = vld [vmem:[%s3217_s1 + $0x150] sm:$0xff]   ;;  %v52_v63 = vld [vmem:[%s3218_s0 + $0xf8] sm:$0xff] }
  0x13   :  { %v2053_v61 = vld [vmem:[%s3217_s1 + $0x110] sm:$0xff]   ;;  %v46_v62 = vld [vmem:[%s3218_s0 + $0xc8] sm:$0xff]  ;;  %v48_v1 = vld [vmem:[%s3218_s0 + $0xd8] sm:$0xff] }
  0x14   :  { %1688 = vmatpush3.bf16.msra.mxu0 %v2034_v18  ;;  %v106_v0 = vpack.c.bf16 %v52_v63, %v46_v62  ;;  %v54_v2 = vld [vmem:[%s3218_s0 + $0x108] sm:$0xff]  ;;  %v45_v3 = vld [vmem:[%s3218_s0 + $0xc0] sm:$0xff]  ;;  %v51_v5 = vld [vmem:[%s3218_s0 + $0xf0] sm:$0xff] }
  0x15   :  { %1740 = vmatpush3.bf16.msra.mxu1 %v2035_v19  ;;  %1689 = vmatprep.subr.bf16.mxu0 %v2036_v20  ;;  %v108_v4 = vpack.c.bf16 %v54_v2, %v48_v1  ;;  %v47_v6 = vld [vmem:[%s3218_s0 + $0xd0] sm:$0xff]  ;;  %v53_v7 = vld [vmem:[%s3218_s0 + $0x100] sm:$0xff]  ;;  %v2054_v8 = vld [vmem:[%s3217_s1 + $0x158] sm:$0xff]   ;;  %v105_v10 = vpack.c.bf16 %v51_v5, %v45_v3 }
  0x16   :  { %1741 = vmatprep.subr.bf16.mxu1 %v2037_v21  ;;  %v2055_v9 = vld [vmem:[%s3217_s1 + $0x118] sm:$0xff]   ;;  %v58_v11 = vld [vmem:[%s3218_s0 + $0x128] sm:$0xff]  ;;  %v107_v14 = vpack.c.bf16 %v53_v7, %v47_v6  ;;  %v57_v18 = vld [vmem:[%s3218_s0 + $0x120] sm:$0xff] }
  0x17   :  { %v64_v12 = vld [vmem:[%s3218_s0 + $0x158] sm:$0xff]  ;;  %v66_v16 = vld [vmem:[%s3218_s0 + $0x168] sm:$0xff]  ;;  %v63_v19 = vld [vmem:[%s3218_s0 + $0x150] sm:$0xff] }
  0x18   :  { %1690 = vmatpush3.bf16.msra.mxu0 %v2038_v22  ;;  %v60_v13 = vld [vmem:[%s3218_s0 + $0x138] sm:$0xff]  ;;  %v112_v15 = vpack.c.bf16 %v64_v12, %v58_v11  ;;  %v2056_v20 = vld [vmem:[%s3217_s1 + $0x160] sm:$0xff]   ;;  %v59_v21 = vld [vmem:[%s3218_s0 + $0x130] sm:$0xff] }
  0x19   :  { %1742 = vmatpush3.bf16.msra.mxu1 %v2039_v23  ;;  %1691 = vmatprep.subr.bf16.mxu0 %v2040_v24  ;;  %v114_v17 = vpack.c.bf16 %v66_v16, %v60_v13  ;;  %v65_v22 = vld [vmem:[%s3218_s0 + $0x160] sm:$0xff]  ;;  %v2058_v24 = vld [vmem:[%s3217_s1 + $0x168] sm:$0xff]   ;;  %v2060_v34 = vld [vmem:[%s3217_s1 + $0x170] sm:$0xff]  }
  0x1a   :  { %1743 = vmatprep.subr.bf16.mxu1 %v2041_v25  ;;  %v2057_v23 = vld [vmem:[%s3217_s1 + $0x120] sm:$0xff]   ;;  %v70_v25 = vld [vmem:[%s3218_s0 + $0x188] sm:$0xff]  ;;  %v75_v36 = vld [vmem:[%s3218_s0 + $0x1b0] sm:$0xff] }
  0x1b   :  { %v69_v35 = vld [vmem:[%s3218_s0 + $0x180] sm:$0xff]  ;;  %v2061_v37 = vld [vmem:[%s3217_s1 + $0x130] sm:$0xff]   ;;  %v88_v41 = vld [vmem:[%s3218_s0 + $0x218] sm:$0xff] }
  0x1c   :  { %1692 = vmatpush3.bf16.msra.mxu0 %v2042_v26  ;;  %v76_v26 = vld [vmem:[%s3218_s0 + $0x1b8] sm:$0xff]  ;;  %v71_v38 = vld [vmem:[%s3218_s0 + $0x190] sm:$0xff]  ;;  %v77_v39 = vld [vmem:[%s3218_s0 + $0x1c0] sm:$0xff] }
  0x1d   :  { %1744 = vmatpush3.bf16.msra.mxu1 %v2043_v27  ;;  %1693 = vmatprep.subr.bf16.mxu0 %v2044_v28  ;;  %v72_v27 = vld [vmem:[%s3218_s0 + $0x198] sm:$0xff]  ;;  %v78_v28 = vld [vmem:[%s3218_s0 + $0x1c8] sm:$0xff]  ;;  %v118_v32 = vpack.c.bf16 %v76_v26, %v70_v25  ;;  %v119_v47 = vpack.c.bf16 %v77_v39, %v71_v38  ;;  %v81_v50 = vld [vmem:[%s3218_s0 + $0x1e0] sm:$0xff] }
  0x1e   :  { %1745 = vmatprep.subr.bf16.mxu1 %v2045_v29  ;;  %v2059_v29 = vld [vmem:[%s3217_s1 + $0x128] sm:$0xff]   ;;  %v120_v33 = vpack.c.bf16 %v78_v28, %v72_v27  ;;  %v84_v42 = vld [vmem:[%s3218_s0 + $0x1f8] sm:$0xff]  ;;  %v37_v1 = vld [vmem:[%s3218_s0 + $0x80] sm:$0xff] }
  0x1f   :  { %v26_v54 = vld [vmem:[%s3218_s0 + $0x28] sm:$0xff]  ;;  %v32_v55 = vld [vmem:[%s3218_s0 + $0x58] sm:$0xff]  ;;  %v43_v2 = vld [vmem:[%s3218_s0 + $0xb0] sm:$0xff] }
  0x20   :  { %1694 = vmatpush3.bf16.msra.mxu0 %v2046_v30  ;;  %v111_v30 = vpack.c.bf16 %v63_v19, %v57_v18  ;;  %v98_v58 = vpack.c.bf16 %v32_v55, %v26_v54  ;;  %v44_v62 = vld [vmem:[%s3218_s0 + $0xb8] sm:$0xff]  ;;  %v50_v3 = vld [vmem:[%s3218_s0 + $0xe8] sm:$0xff]  ;;  %v103_v5 = vpack.c.bf16 %v43_v2, %v37_v1  ;;  %v49_v7 = vld [vmem:[%s3218_s0 + $0xe0] sm:$0xff] }
  0x21   :  { %1746 = vmatpush3.bf16.msra.mxu1 %v2047_v31  ;;  %1783 = vmatprep.subr.bf16.mxu0 %v2048_v44  ;;  %v113_v31 = vpack.c.bf16 %v65_v22, %v59_v21  ;;  %v2062_v44 = vld [vmem:[%s3217_s1 + $0x178] sm:$0xff]   ;;  %v61_v13 = vld [vmem:[%s3218_s0 + $0x140] sm:$0xff]  ;;  %v86_v21 = vld [vmem:[%s3218_s0 + $0x208] sm:$0xff] }
  0x22   :  { %v80_v16 = vld [vmem:[%s3218_s0 + $0x1d8] sm:$0xff]  ;;  %v73_v19 = vld [vmem:[%s3218_s0 + $0x1a0] sm:$0xff]  ;;  %v91_v26 = vld [vmem:[%s3218_s0 + $0x230] sm:$0xff] }
  0x23   :  { %565 = vmatmul.mubr.bf16.vlgmr.msra.gmra.mrb[0].mxu0 %v93_v40  ;;  %v82_v40 = vld [vmem:[%s3218_s0 + $0x1e8] sm:$0xff]  ;;  %v92_v22 = vld [vmem:[%s3218_s0 + $0x238] sm:$0xff]  ;;  %v85_v25 = vld [vmem:[%s3218_s0 + $0x200] sm:$0xff] }
  0x24   :  { %646 = vmatmul.mubr.bf16.vlgmr.msra.gmra.mrb[0].mxu1 %v95_v43  ;;  %1784 = vmatpush3.bf16.msra.mxu0 %v2049_v45  ;;  %v90_v43 = vld [vmem:[%s3218_s0 + $0x228] sm:$0xff]  ;;  %v2063_v45 = vld [vmem:[%s3217_s1 + $0x138] sm:$0xff]   ;;  %v124_v48 = vpack.c.bf16 %v88_v41, %v82_v40  ;;  %v127_v27 = vpack.c.bf16 %v91_v26, %v85_v25  ;;  %v225_v28 = vld [vmem:[%s3219_s2] sm:$0xff] }
  0x25   :  { %1785 = vmatprep.subr.bf16.mxu0 %v2050_v46  ;;  %572 = vmatprep.mubr.bf16.mxu0 %v100_v51  ;;  %v117_v46 = vpack.c.bf16 %v75_v36, %v69_v35  ;;  %v126_v49 = vpack.c.bf16 %v90_v43, %v84_v42  ;;  %v87_v51 = vld [vmem:[%s3218_s0 + $0x210] sm:$0xff]  ;;  %v230_v35 = vld [vmem:[%s3219_s2 + $0x28] sm:$0xff]  ;;  %v232_v38 = vld [vmem:[%s3219_s2 + $0x38] sm:$0xff] }
  0x26   :  { %653 = vmatprep.mubr.bf16.mxu1 %v102_v52  ;;  %v83_v52 = vld [vmem:[%s3218_s0 + $0x1f0] sm:$0xff]  ;;  %v123_v56 = vpack.c.bf16 %v87_v51, %v81_v50  ;;  %v233_v40 = vld [vmem:[%s3219_s2 + $0x40] sm:$0xff]  ;;  %v234_v41 = vld [vmem:[%s3219_s2 + $0x48] sm:$0xff] }
  0x27   :  { %v1970_v42 = vpack.c.bf16 %v234_v41, %v233_v40  ;;  %v235_v43 = vld [vmem:[%s3219_s2 + $0x50] sm:$0xff]  ;;  %v240_v50 = vld [vmem:[%s3219_s2 + $0x78] sm:$0xff] }
  0x28   :  { %1786 = vmatpush3.bf16.msra.mxu0 %v2051_v53  ;;  %v89_v53 = vld [vmem:[%s3218_s0 + $0x220] sm:$0xff] }
  0x29   :  { %1787 = vmatprep.subr.bf16.mxu0 %v2052_v60  ;;  %v31_v60 = vld [vmem:[%s3218_s0 + $0x50] sm:$0xff] }
  0x2b   :  { %573 = vmatmul.mubr.bf16.gmra.mrb[4].mxu0 %v99_v57  ;;  %v125_v57 = vpack.c.bf16 %v89_v53, %v83_v52 }
  0x2c   :  { %654 = vmatmul.mubr.bf16.gmra.mrb[4].mxu1 %v101_v59  ;;  %1788 = vmatpush3.bf16.msra.mxu0 %v2053_v61  ;;  %v25_v59 = vld [vmem:[%s3218_s0 + $0x20] sm:$0xff]  ;;  %v38_v61 = vld [vmem:[%s3218_s0 + $0x88] sm:$0xff] }
  0x2d   :  { %580 = vmatprep.mubr.bf16.mxu0 %v106_v0  ;;  %661 = vmatprep.mubr.bf16.mxu1 %v108_v4  ;;  %v97_v63 = vpack.c.bf16 %v31_v60, %v25_v59  ;;  %v104_v0 = vpack.c.bf16 %v44_v62, %v38_v61  ;;  %v56_v4 = vld [vmem:[%s3218_s0 + $0x118] sm:$0xff] }
  0x2e   :  { %1789 = vmatprep.subr.bf16.mxu0 %v2054_v8  ;;  %v110_v6 = vpack.c.bf16 %v56_v4, %v50_v3  ;;  %v55_v8 = vld [vmem:[%s3218_s0 + $0x110] sm:$0xff] }
  0x2f   :  { %v109_v11 = vpack.c.bf16 %v55_v8, %v49_v7 }
  0x30   :  { %1790 = vmatpush3.bf16.msra.mxu0 %v2055_v9  ;;  %v62_v9 = vld [vmem:[%s3218_s0 + $0x148] sm:$0xff] }
  0x31   :  { %1791 = vmatprep.subr.bf16.mxu0 %v2056_v20  ;;  %v79_v20 = vld [vmem:[%s3218_s0 + $0x1d0] sm:$0xff] }
  0x33   :  { %581 = vmatmul.mubr.bf16.gmra.mrb[8].mxu0 %v105_v10  ;;  %v68_v10 = vld [vmem:[%s3218_s0 + $0x178] sm:$0xff] }
  0x34   :  { %662 = vmatmul.mubr.bf16.gmra.mrb[8].mxu1 %v107_v14  ;;  %588 = vmatprep.mubr.bf16.mxu0 %v112_v15  ;;  %v116_v12 = vpack.c.bf16 %v68_v10, %v62_v9  ;;  %v67_v14 = vld [vmem:[%s3218_s0 + $0x170] sm:$0xff]  ;;  %v74_v15 = vld [vmem:[%s3218_s0 + $0x1a8] sm:$0xff] }
  0x35   :  { %669 = vmatprep.mubr.bf16.mxu1 %v114_v17  ;;  %1792 = vmatpush3.bf16.msra.mxu0 %v2057_v23  ;;  %v115_v17 = vpack.c.bf16 %v67_v14, %v61_v13  ;;  %v122_v18 = vpack.c.bf16 %v80_v16, %v74_v15  ;;  %v121_v23 = vpack.c.bf16 %v79_v20, %v73_v19 }
  0x36   :  { %1793 = vmatprep.subr.bf16.mxu0 %v2058_v24  ;;  %v128_v24 = vpack.c.bf16 %v92_v22, %v86_v21 }
  0x39   :  { %1794 = vmatpush3.bf16.msra.mxu0 %v2059_v29  ;;  %v226_v29 = vld [vmem:[%s3219_s2 + $0x8] sm:$0xff] }
  0x3a   :  { %1795 = vmatprep.subr.bf16.mxu0 %v2060_v34  ;;  %v229_v34 = vld [vmem:[%s3219_s2 + $0x20] sm:$0xff] }
  0x3b   :  { %589 = vmatmul.mubr.bf16.gmra.mrb[12].mxu0 %v111_v30  ;;  %v1954_v30 = vpack.c.bf16 %v226_v29, %v225_v28  ;;  %v1962_v36 = vpack.c.bf16 %v230_v35, %v229_v34 }
  0x3c   :  { %670 = vmatmul.mubr.bf16.gmra.mrb[12].mxu1 %v113_v31  ;;  %596 = vmatprep.mubr.bf16.mxu0 %v118_v32  ;;  %v227_v31 = vld [vmem:[%s3219_s2 + $0x10] sm:$0xff]  ;;  %v228_v32 = vld [vmem:[%s3219_s2 + $0x18] sm:$0xff] }
  0x3d   :  { %677 = vmatprep.mubr.bf16.mxu1 %v120_v33  ;;  %1796 = vmatpush3.bf16.msra.mxu0 %v2061_v37  ;;  %v1958_v33 = vpack.c.bf16 %v228_v32, %v227_v31  ;;  %v231_v37 = vld [vmem:[%s3219_s2 + $0x30] sm:$0xff] }
  0x3e   :  { %1797 = vmatprep.subr.bf16.mxu0 %v2062_v44  ;;  %1955 = vmatprep.subr.bf16.mxu1 %v1954_v30  ;;  %v1966_v39 = vpack.c.bf16 %v232_v38, %v231_v37  ;;  %v236_v44 = vld [vmem:[%s3219_s2 + $0x58] sm:$0xff] }
  0x3f   :  { %1957 = vmatpush3.bf16.msra.mxu1 %v1954_v30 }
  0x40   :  { %1959 = vmatprep.subr.bf16.mxu1 %v1958_v33 }
  0x41   :  { %1798 = vmatpush3.bf16.msra.mxu0 %v2063_v45  ;;  %v1974_v45 = vpack.c.bf16 %v236_v44, %v235_v43 }
  0x43   :  { %597 = vmatmul.mubr.bf16.gmra.mrb[16].mxu0 %v117_v46  ;;  %1961 = vmatpush3.bf16.msra.mxu1 %v1958_v33  ;;  %v237_v46 = vld [vmem:[%s3219_s2 + $0x60] sm:$0xff] }
  0x44   :  { %678 = vmatmul.mubr.bf16.gmra.mrb[16].mxu1 %v119_v47  ;;  %604 = vmatprep.mubr.bf16.mxu0 %v124_v48  ;;  %v238_v47 = vld [vmem:[%s3219_s2 + $0x68] sm:$0xff] }
  0x45   :  { %685 = vmatprep.mubr.bf16.mxu1 %v126_v49  ;;  %1963 = vmatprep.subr.bf16.mxu1 %v1962_v36  ;;  %v1978_v48 = vpack.c.bf16 %v238_v47, %v237_v46  ;;  %v239_v49 = vld [vmem:[%s3219_s2 + $0x70] sm:$0xff] }
  0x46   :  { %v1982_v51 = vpack.c.bf16 %v240_v50, %v239_v49 }
  0x47   :  { %1965 = vmatpush3.bf16.msra.mxu1 %v1962_v36 }
  0x48   :  { %1967 = vmatprep.subr.bf16.mxu1 %v1966_v39 }
  0x4b   :  { %605 = vmatmul.mubr.bf16.gmra.mrb[20].mxu0 %v123_v56  ;;  %1969 = vmatpush3.bf16.msra.mxu1 %v1966_v39 }
  0x4c   :  { %686 = vmatmul.mubr.bf16.gmra.mrb[20].mxu1 %v125_v57  ;;  %726 = vmatprep.mubr.bf16.mxu0 %v98_v58 }
  0x4d   :  { %1971 = vmatprep.subr.bf16.mxu1 %v1970_v42 }
  0x4f   :  { %1973 = vmatpush3.bf16.msra.mxu1 %v1970_v42 }
  0x50   :  { %1975 = vmatprep.subr.bf16.mxu1 %v1974_v45 }
  0x53   :  { %727 = vmatmul.mubr.bf16.vlgmr.msra.gmra.mrb[24].mxu0 %v97_v63  ;;  %1977 = vmatpush3.bf16.msra.mxu1 %v1974_v45 }
  0x54   :  { %734 = vmatprep.mubr.bf16.mxu0 %v104_v0  ;;  %1979 = vmatprep.subr.bf16.mxu1 %v1978_v48 }
  0x57   :  { %1981 = vmatpush3.bf16.msra.mxu1 %v1978_v48 }
  0x58   :  { %1983 = vmatprep.subr.bf16.mxu1 %v1982_v51 }
  0x5b   :  { %735 = vmatmul.mubr.bf16.gmra.mrb[28].mxu0 %v103_v5  ;;  %1985 = vmatpush3.bf16.msra.mxu1 %v1982_v51 }
  0x5c   :  { %742 = vmatprep.mubr.bf16.mxu0 %v110_v6 }
  0x63   :  { %743 = vmatmul.mubr.bf16.gmra.mrb[32].mxu0 %v109_v11 }
  0x64   :  { %750 = vmatprep.mubr.bf16.mxu0 %v116_v12 }
  0x6b   :  { %751 = vmatmul.mubr.bf16.gmra.mrb[36].mxu0 %v115_v17 }
  0x6c   :  { %758 = vmatprep.mubr.bf16.mxu0 %v122_v18 }
  0x73   :  { %759 = vmatmul.mubr.bf16.gmra.mrb[40].mxu0 %v121_v23 }
  0x74   :  { %766 = vmatprep.mubr.bf16.mxu0 %v128_v24 }
  0x7b   :  { %767 = vmatmul.mubr.bf16.gmra.mrb[44].mxu0 %v127_v27 }
  0xf6   :  { %v1695_v52 = vpop.f32.mrb[0].mxu0 }
  0xf7   :  { %v1747_v53 = vpop.f32.mrb[0].mxu1  ;;  %v1696_v54 = vpop.f32.mrb[1].mxu0 }
  0xf8   :  { %v1697_v55 = vadd.f32 %v1696_v54, %v1695_v52  ;;  %v1748_v56 = vpop.f32.mrb[1].mxu1  ;;  %v1698_v57 = vpop.f32.mrb[2].mxu0 }
  0xf9   :  { %v1749_v58 = vadd.f32 %v1748_v56, %v1747_v53  ;;  %v1750_v59 = vpop.f32.mrb[2].mxu1  ;;  %v1699_v60 = vpop.f32.mrb[3].mxu0 }
  0xfa   :  { %v1700_v61 = vadd.f32 %v1699_v60, %v1698_v57  ;;  %v1751_v62 = vpop.f32.mrb[3].mxu1 }
  0xfb   :  { %v2672_v63 = vadd.f32 %v1749_v58, %v1697_v55  ;;  %v1752_v0 = vadd.f32 %v1751_v62, %v1750_v59 }
  0xfd   :  { %v2674_v1 = vadd.f32 %v1752_v0, %v1700_v61 }
  0xfe   :  { %v1701_v2 = vpop.f32.mrb[4].mxu0 }
  0xff   :  { %v1753_v3 = vpop.f32.mrb[4].mxu1  ;;  %v1702_v4 = vpop.f32.mrb[5].mxu0 }
 0x100   :  { %v1703_v5 = vadd.f32 %v1702_v4, %v1701_v2  ;;  %v1754_v6 = vpop.f32.mrb[5].mxu1  ;;  %v1704_v7 = vpop.f32.mrb[6].mxu0 }
 0x101   :  { %v1755_v8 = vadd.f32 %v1754_v6, %v1753_v3  ;;  %v1756_v9 = vpop.f32.mrb[6].mxu1  ;;  %v1705_v10 = vpop.f32.mrb[7].mxu0 }
 0x102   :  { %v1706_v11 = vadd.f32 %v1705_v10, %v1704_v7  ;;  %v1757_v12 = vpop.f32.mrb[7].mxu1 }
 0x103   :  { %v2676_v13 = vadd.f32 %v1755_v8, %v1703_v5  ;;  %v1758_v14 = vadd.f32 %v1757_v12, %v1756_v9 }
 0x105   :  { %v2678_v15 = vadd.f32 %v1758_v14, %v1706_v11 }
 0x106   :  { %v1707_v16 = vpop.f32.mrb[8].mxu0 }
 0x107   :  { %v1759_v17 = vpop.f32.mrb[8].mxu1  ;;  %v1708_v18 = vpop.f32.mrb[9].mxu0 }
 0x108   :  { %v1709_v19 = vadd.f32 %v1708_v18, %v1707_v16  ;;  %v1760_v20 = vpop.f32.mrb[9].mxu1  ;;  %v1710_v21 = vpop.f32.mrb[10].mxu0 }
 0x109   :  { %v1761_v22 = vadd.f32 %v1760_v20, %v1759_v17  ;;  %v1762_v23 = vpop.f32.mrb[10].mxu1  ;;  %v1711_v24 = vpop.f32.mrb[11].mxu0 }
 0x10a   :  { %v1712_v25 = vadd.f32 %v1711_v24, %v1710_v21  ;;  %v1763_v26 = vpop.f32.mrb[11].mxu1 }
 0x10b   :  { %v2680_v27 = vadd.f32 %v1761_v22, %v1709_v19  ;;  %v1764_v28 = vadd.f32 %v1763_v26, %v1762_v23 }
 0x10d   :  { %v2682_v29 = vadd.f32 %v1764_v28, %v1712_v25 }
 0x10e   :  { %v1713_v30 = vpop.f32.mrb[12].mxu0 }
 0x10f   :  { %v1765_v31 = vpop.f32.mrb[12].mxu1  ;;  %v1714_v32 = vpop.f32.mrb[13].mxu0 }
 0x110   :  { %v1715_v33 = vadd.f32 %v1714_v32, %v1713_v30  ;;  %v1766_v34 = vpop.f32.mrb[13].mxu1  ;;  %v1716_v35 = vpop.f32.mrb[14].mxu0 }
 0x111   :  { %v1767_v36 = vadd.f32 %v1766_v34, %v1765_v31  ;;  %v1768_v37 = vpop.f32.mrb[14].mxu1  ;;  %v1717_v38 = vpop.f32.mrb[15].mxu0 }
 0x112   :  { %v1718_v39 = vadd.f32 %v1717_v38, %v1716_v35  ;;  %v1769_v40 = vpop.f32.mrb[15].mxu1 }
 0x113   :  { %v2684_v41 = vadd.f32 %v1767_v36, %v1715_v33  ;;  %v1770_v42 = vadd.f32 %v1769_v40, %v1768_v37 }
 0x115   :  { %v2686_v43 = vadd.f32 %v1770_v42, %v1718_v39 }
 0x116   :  { %v1719_v44 = vpop.f32.mrb[16].mxu0 }
 0x117   :  { %v1771_v45 = vpop.f32.mrb[16].mxu1  ;;  %v1720_v46 = vpop.f32.mrb[17].mxu0 }
 0x118   :  { %v1721_v47 = vadd.f32 %v1720_v46, %v1719_v44  ;;  %v1772_v48 = vpop.f32.mrb[17].mxu1  ;;  %v1722_v49 = vpop.f32.mrb[18].mxu0 }
 0x119   :  { %v1773_v50 = vadd.f32 %v1772_v48, %v1771_v45  ;;  %v1774_v51 = vpop.f32.mrb[18].mxu1  ;;  %v1723_v52 = vpop.f32.mrb[19].mxu0 }
 0x11a   :  { %v1724_v53 = vadd.f32 %v1723_v52, %v1722_v49  ;;  %v1775_v54 = vpop.f32.mrb[19].mxu1 }
 0x11b   :  { %v2688_v55 = vadd.f32 %v1773_v50, %v1721_v47  ;;  %v1776_v56 = vadd.f32 %v1775_v54, %v1774_v51 }
 0x11d   :  { %v2690_v57 = vadd.f32 %v1776_v56, %v1724_v53 }
 0x11e   :  { %v1725_v58 = vpop.f32.mrb[20].mxu0 }
 0x11f   :  { %v1777_v59 = vpop.f32.mrb[20].mxu1  ;;  %v1726_v60 = vpop.f32.mrb[21].mxu0 }
 0x120   :  { %v1727_v61 = vadd.f32 %v1726_v60, %v1725_v58  ;;  %v1778_v62 = vpop.f32.mrb[21].mxu1  ;;  %v1728_v0 = vpop.f32.mrb[22].mxu0 }
 0x121   :  { %v1779_v2 = vadd.f32 %v1778_v62, %v1777_v59  ;;  %v1780_v3 = vpop.f32.mrb[22].mxu1  ;;  %v1729_v4 = vpop.f32.mrb[23].mxu0 }
 0x122   :  { %v1730_v5 = vadd.f32 %v1729_v4, %v1728_v0  ;;  %v1781_v6 = vpop.f32.mrb[23].mxu1 }
 0x123   :  { %v2692_v7 = vadd.f32 %v1779_v2, %v1727_v61  ;;  %v1782_v8 = vadd.f32 %v1781_v6, %v1780_v3 }
 0x125   :  { %v2694_v9 = vadd.f32 %v1782_v8, %v1730_v5 }
 0x126   :  { %v1799_v10 = vpop.f32.mrb[24].mxu0 }
 0x127   :  { %v1800_v11 = vpop.f32.mrb[25].mxu0 }
 0x128   :  { %v1801_v12 = vadd.f32 %v1800_v11, %v1799_v10  ;;  %v1802_v14 = vpop.f32.mrb[26].mxu0 }
 0x129   :  { %v1803_v16 = vpop.f32.mrb[27].mxu0 }
 0x12a   :  { %v729_v17 = vadd.f32 %v1801_v12, %v2672_v63  ;;  %v1804_v18 = vadd.f32 %v1803_v16, %v1802_v14 }
 0x12c   :  { %v732_v19 = vadd.f32 %v1804_v18, %v2674_v1  ;;  %1909 = vmatprep.mubr.f32.mxu1 %v729_v17  ;;  %v775_v20 = vmul.f32 %v729_v17, %v729_v17 }
 0x12e   :  { %v1805_v21 = vpop.f32.mrb[28].mxu0  ;;  %1910 = vmatmul.mubr.f32.vlgmr.msra.gmra.mrb[24].mxu1 %v732_v19  ;;  %787 = vadd.xlane.f32.xlu0 %v775_v20  ;;  %v776_v25 = vmul.f32 %v732_v19, %v732_v19 }
 0x12f   :  { %v1806_v22 = vpop.f32.mrb[29].mxu0 }
 0x130   :  { %v1807_v23 = vadd.f32 %v1806_v22, %v1805_v21  ;;  %v1808_v24 = vpop.f32.mrb[30].mxu0 }
 0x131   :  { %v1809_v26 = vpop.f32.mrb[31].mxu0 }
 0x132   :  { %v737_v28 = vadd.f32 %v1807_v23, %v2676_v13  ;;  %v1810_v30 = vadd.f32 %v1809_v26, %v1808_v24  ;;  %789 = vadd.xlane.f32.xlu0 %v776_v25 }
 0x134   :  { %v740_v31 = vadd.f32 %v1810_v30, %v2678_v15  ;;  %1912 = vmatprep.mubr.f32.mxu1 %v737_v28  ;;  %v777_v63 = vmul.f32 %v737_v28, %v737_v28 }
 0x136   :  { %v1811_v32 = vpop.f32.mrb[32].mxu0  ;;  %791 = vadd.xlane.f32.xlu1 %v777_v63  ;;  %1913 = vmatmul.mubr.f32.gmra.mrb[26].mxu1 %v740_v31  ;;  %v778_v35 = vmul.f32 %v740_v31, %v740_v31 }
 0x137   :  { %v1812_v1 = vpop.f32.mrb[33].mxu0 }
 0x138   :  { %v1813_v33 = vadd.f32 %v1812_v1, %v1811_v32  ;;  %v1814_v34 = vpop.f32.mrb[34].mxu0  ;;  %v2732_v32 = vld [vmem:[%s3220_s3] sm:$0x1] }
 0x139   :  { %v1815_v36 = vpop.f32.mrb[35].mxu0 }
 0x13a   :  { %v745_v37 = vadd.f32 %v1813_v33, %v2680_v27  ;;  %v1816_v38 = vadd.f32 %v1815_v36, %v1814_v34  ;;  %793 = vadd.xlane.f32.xlu1 %v778_v35 }
 0x13c   :  { %v748_v13 = vadd.f32 %v1816_v38, %v2682_v29  ;;  %1915 = vmatprep.mubr.f32.mxu1 %v745_v37  ;;  %v779_v39 = vmul.f32 %v745_v37, %v745_v37  ;;  %v2736_v38 = vsub.f32 1.0, %v2732_v32 }
 0x13e   :  { %v1817_v40 = vpop.f32.mrb[36].mxu0  ;;  %1916 = vmatmul.mubr.f32.gmra.mrb[28].mxu1 %v748_v13  ;;  %795 = vadd.xlane.f32.xlu0 %v779_v39  ;;  %v780_v15 = vmul.f32 %v748_v13, %v748_v13  ;;  %v1129_v13 = vlaneseq }
 0x13f   :  { %v1818_v42 = vpop.f32.mrb[37].mxu0 }
 0x140   :  { %v1819_v44 = vadd.f32 %v1818_v42, %v1817_v40  ;;  %v1820_v45 = vpop.f32.mrb[38].mxu0  ;;  %797 = vadd.xlane.f32.xlu1 %v780_v15 }
 0x141   :  { %v1821_v46 = vpop.f32.mrb[39].mxu0 }
 0x142   :  { %v753_v47 = vadd.f32 %v1819_v44, %v2684_v41  ;;  %v1822_v48 = vadd.f32 %v1821_v46, %v1820_v45 }
 0x144   :  { %v756_v27 = vadd.f32 %v1822_v48, %v2686_v43  ;;  %1918 = vmatprep.mubr.f32.mxu1 %v753_v47  ;;  %v781_v49 = vmul.f32 %v753_v47, %v753_v47 }
 0x146   :  { %v1823_v50 = vpop.f32.mrb[40].mxu0  ;;  %1919 = vmatmul.mubr.f32.gmra.mrb[30].mxu1 %v756_v27  ;;  %799 = vadd.xlane.f32.xlu0 %v781_v49  ;;  %v782_v29 = vmul.f32 %v756_v27, %v756_v27 }
 0x147   :  { %v1824_v51 = vpop.f32.mrb[41].mxu0 }
 0x148   :  { %v1825_v52 = vadd.f32 %v1824_v51, %v1823_v50  ;;  %v1826_v53 = vpop.f32.mrb[42].mxu0  ;;  %801 = vadd.xlane.f32.xlu1 %v782_v29 }
 0x149   :  { %v1827_v54 = vpop.f32.mrb[43].mxu0 }
 0x14a   :  { %v761_v56 = vadd.f32 %v1825_v52, %v2688_v55  ;;  %v1828_v58 = vadd.f32 %v1827_v54, %v1826_v53 }
 0x14c   :  { %v764_v59 = vadd.f32 %v1828_v58, %v2690_v57  ;;  %1921 = vmatprep.mubr.f32.mxu1 %v761_v56  ;;  %v783_v41 = vmul.f32 %v761_v56, %v761_v56 }
 0x14e   :  { %v1829_v60 = vpop.f32.mrb[44].mxu0  ;;  %1922 = vmatmul.mubr.f32.gmra.mrb[32].mxu1 %v764_v59  ;;  %803 = vadd.xlane.f32.xlu0 %v783_v41  ;;  %v784_v43 = vmul.f32 %v764_v59, %v764_v59 }
 0x14f   :  { %v1830_v61 = vpop.f32.mrb[45].mxu0 }
 0x150   :  { %v1831_v62 = vadd.f32 %v1830_v61, %v1829_v60  ;;  %v1832_v0 = vpop.f32.mrb[46].mxu0  ;;  %805 = vadd.xlane.f32.xlu1 %v784_v43 }
 0x151   :  { %v1833_v2 = vpop.f32.mrb[47].mxu0 }
 0x152   :  { %v769_v3 = vadd.f32 %v1831_v62, %v2692_v7  ;;  %v1834_v4 = vadd.f32 %v1833_v2, %v1832_v0 }
 0x154   :  { %v772_v5 = vadd.f32 %v1834_v4, %v2694_v9  ;;  %1924 = vmatprep.mubr.f32.mxu1 %v769_v3  ;;  %v785_v55 = vmul.f32 %v769_v3, %v769_v3 }
 0x156   :  { %1925 = vmatmul.mubr.f32.gmra.mrb[34].mxu1 %v772_v5  ;;  %807 = vadd.xlane.f32.xlu0 %v785_v55  ;;  %v786_v57 = vmul.f32 %v772_v5, %v772_v5 }
 0x158   :  { %809 = vadd.xlane.f32.xlu1 %v786_v57 }
 0x1bb   :  { %v788_v6 = vpop.xlane.xlu0 %787 }
 0x1bc   :  { %2064 = vrsqrt.f32 %v788_v6  ;;  %vm813_vm0 = vcmp.eq.f32.partialorder %v788_v6, inf  ;;  %v816_v21 = vand.u32 2147483648, %v788_v6  ;;  %vm815_vm1 = vcmp.eq.f32.partialorder %v788_v6, 0.0 }
 0x1bf   :  { %v790_v10 = vpop.xlane.xlu0 %789 }
 0x1c0   :  { %2066 = vrsqrt.f32 %v790_v10  ;;  %vm820_vm2 = vcmp.eq.f32.partialorder %v790_v10, inf  ;;  %v823_v63 = vand.u32 2147483648, %v790_v10  ;;  %vm822_vm3 = vcmp.eq.f32.partialorder %v790_v10, 0.0 }
 0x1c3   :  { %v792_v8 = vpop.xlane.xlu1 %791 }
 0x1c4   :  { %2068 = vrsqrt.f32 %v792_v8  ;;  %vm827_vm4 = vcmp.eq.f32.partialorder %v792_v8, inf  ;;  %vm829_vm5 = vcmp.eq.f32.partialorder %v792_v8, 0.0  ;;  %v830_v37 = vand.u32 2147483648, %v792_v8 }
 0x1c6   :  { %v2065_v12 = vpop.eup %2064 }
 0x1c7   :  { %v2708_v11 = vpop.xlane.xlu1 %793  ;;  %v812_v9 = vmul.f32 %v2065_v12, %v788_v6 }
 0x1c8   :  { %2070 = vrsqrt.f32 %v2708_v11  ;;  %vm834_vm6 = vcmp.eq.f32.partialorder %v2708_v11, inf  ;;  %vm836_vm7 = vcmp.eq.f32.partialorder %v2708_v11, 0.0  ;;  %v837_v47 = vand.u32 2147483648, %v2708_v11 }
 0x1c9   :  { %v814_v19 = vsel %vm813_vm0, %v788_v6, %v812_v9 }
 0x1ca   :  { %v2067_v17 = vpop.eup %2066  ;;  %v817_v24 = vsel %vm815_vm1, %v816_v21, %v814_v19 }
 0x1cb   :  { %v2710_v14 = vpop.xlane.xlu0 %795  ;;  %v819_v22 = vmul.f32 %v2067_v17, %v790_v10  ;;  %v895_v31 = vmax.f32 %v817_v24, 1e-15 }
 0x1cc   :  { %vm841_vm8 = vcmp.eq.f32.partialorder %v2710_v14, inf  ;;  %vm843_vm9 = vcmp.eq.f32.partialorder %v2710_v14, 0.0  ;;  %v844_v54 = vand.u32 2147483648, %v2710_v14 }
 0x1cd   :  { %v2713_v7 = vpop.xlane.xlu1 %797  ;;  %v821_v30 = vsel %vm820_vm2, %v790_v10, %v819_v22 }
 0x1ce   :  { %2072 = vrsqrt.f32 %v2713_v7  ;;  %v2069_v20 = vpop.eup %2068  ;;  %v824_v34 = vsel %vm822_vm3, %v823_v63, %v821_v30  ;;  %vm848_vm10 = vcmp.eq.f32.partialorder %v2713_v7, inf  ;;  %vm850_vm11 = vcmp.eq.f32.partialorder %v2713_v7, 0.0 }
 0x1cf   :  { %2074 = vrsqrt.f32 %v2710_v14  ;;  %v826_v26 = vmul.f32 %v2069_v20, %v792_v8  ;;  %v896_v44 = vmax.f32 %v824_v34, 1e-15  ;;  %v851_v56 = vand.u32 2147483648, %v2713_v7 }
 0x1d1   :  { %v828_v35 = vsel %vm827_vm4, %v792_v8, %v826_v26 }
 0x1d2   :  { %v2071_v25 = vpop.eup %2070  ;;  %v831_v45 = vsel %vm829_vm5, %v830_v37, %v828_v35 }
 0x1d3   :  { %v2716_v16 = vpop.xlane.xlu0 %799  ;;  %v833_v33 = vmul.f32 %v2071_v25, %v2708_v11  ;;  %v897_v29 = vmax.f32 %v831_v45, 1e-15 }
 0x1d4   :  { %2076 = vrsqrt.f32 %v2716_v16  ;;  %vm855_vm12 = vcmp.eq.f32.partialorder %v2716_v16, inf  ;;  %vm857_vm14 = vcmp.eq.f32.partialorder %v2716_v16, 0.0  ;;  %v858_v62 = vand.u32 2147483648, %v2716_v16 }
 0x1d5   :  { %v2718_v18 = vpop.xlane.xlu1 %801  ;;  %v835_v46 = vsel %vm834_vm6, %v2708_v11, %v833_v33  ;;  %v1130_v11 = vshrl.u32 %v1129_v13, 7 }
 0x1d6   :  { %2078 = vrsqrt.f32 %v2718_v18  ;;  %v838_v51 = vsel %vm836_vm7, %v837_v47, %v835_v46  ;;  %vm862_vm13 = vcmp.eq.f32.partialorder %v2718_v18, inf  ;;  %vm864_vm15 = vcmp.eq.f32.partialorder %v2718_v18, 0.0 }
 0x1d7   :  { %v898_v41 = vmax.f32 %v838_v51, 1e-15  ;;  %v865_v3 = vand.u32 2147483648, %v2718_v18  ;;  %v1131_v63 = vsub.s32 0, %v1130_v11 }
 0x1d8   :  { %v2073_v1 = vpop.eup %2072 }
 0x1d9   :  { %v2075_v36 = vpop.eup %2074  ;;  %v847_v40 = vmul.f32 %v2073_v1, %v2713_v7  ;;  %v1234_v1 = vmul.f32 %v2736_v38, %v2736_v38 }
 0x1da   :  { %v840_v48 = vmul.f32 %v2075_v36, %v2710_v14 }
 0x1db   :  { %v2723_v23 = vpop.xlane.xlu0 %803  ;;  %v849_v52 = vsel %vm848_vm10, %v2713_v7, %v847_v40 }
 0x1dc   :  { %2080 = vrsqrt.f32 %v2723_v23  ;;  %v842_v59 = vsel %vm841_vm8, %v2710_v14, %v840_v48  ;;  %v852_v60 = vsel %vm850_vm11, %v851_v56, %v849_v52  ;;  %vm869_vm0 = vcmp.eq.f32.partialorder %v2723_v23, inf }
 0x1dd   :  { %v2726_v28 = vpop.xlane.xlu1 %805  ;;  %v845_v2 = vsel %vm843_vm9, %v844_v54, %v842_v59  ;;  %v900_v55 = vmax.f32 %v852_v60, 1e-15  ;;  %v872_v7 = vand.u32 2147483648, %v2723_v23  ;;  %vm871_vm2 = vcmp.eq.f32.partialorder %v2723_v23, 0.0 }
 0x1de   :  { %2082 = vrsqrt.f32 %v2726_v28  ;;  %v2077_v39 = vpop.eup %2076  ;;  %v899_v14 = vmax.f32 %v845_v2, 1e-15  ;;  %vm876_vm1 = vcmp.eq.f32.partialorder %v2726_v28, inf  ;;  %vm878_vm3 = vcmp.eq.f32.partialorder %v2726_v28, 0.0 }
 0x1df   :  { %2084 = vtanh.f32 %v895_v31  ;;  %v854_v49 = vmul.f32 %v2077_v39, %v2716_v16  ;;  %vm1515_vm8 = vcmask 785408  }
 0x1e0   :  { %v2079_v42 = vpop.eup %2078 }
 0x1e1   :  { %v861_v53 = vmul.f32 %v2079_v42, %v2718_v18  ;;  %v856_v43 = vsel %vm855_vm12, %v2716_v16, %v854_v49  ;;  %v2804_v42 = vrot.slane %v2732_v32, %v1131_v63 }
 0x1e2   :  { %v859_v57 = vsel %vm857_vm14, %v858_v62, %v856_v43 }
 0x1e3   :  { %v2741_v15 = vpop.xlane.xlu0 %807  ;;  %v863_v0 = vsel %vm862_vm13, %v2718_v18, %v861_v53  ;;  %v901_v16 = vmax.f32 %v859_v57, 1e-15  ;;  %v879_v18 = vand.u32 2147483648, %v2726_v28 }
 0x1e4   :  { %2086 = vrsqrt.f32 %v2741_v15  ;;  %v866_v8 = vsel %vm864_vm15, %v865_v3, %v863_v0  ;;  %vm883_vm4 = vcmp.eq.f32.partialorder %v2741_v15, inf  ;;  %vm885_vm6 = vcmp.eq.f32.partialorder %v2741_v15, 0.0 }
 0x1e5   :  { %v2748_v27 = vpop.xlane.xlu1 %809  ;;  %2088 = vrcp.f32 %v895_v31  ;;  %v902_v19 = vmax.f32 %v866_v8, 1e-15 }
 0x1e6   :  { %2090 = vrsqrt.f32 %v2748_v27  ;;  %v2081_v50 = vpop.eup %2080  ;;  %vm890_vm5 = vcmp.eq.f32.partialorder %v2748_v27, inf  ;;  %v893_v39 = vand.u32 2147483648, %v2748_v27  ;;  %vm892_vm7 = vcmp.eq.f32.partialorder %v2748_v27, 0.0 }
 0x1e7   :  { %2092 = vtanh.f32 %v896_v44  ;;  %v868_v61 = vmul.f32 %v2081_v50, %v2723_v23 }
 0x1e8   :  { %v2083_v58 = vpop.eup %2082  ;;  %2094 = vrcp.f32 %v896_v44  ;;  %v1193_v44 = vmul.f32 2.0, %v2736_v38 }
 0x1e9   :  { %2096 = vtanh.f32 %v897_v29  ;;  %v875_v4 = vmul.f32 %v2083_v58, %v2726_v28  ;;  %v2776_v5 = vpop.eup %2084  ;;  %v870_v10 = vsel %vm869_vm0, %v2723_v23, %v868_v61 }
 0x1ea   :  { %2098 = vrcp.f32 %v897_v29  ;;  %v873_v20 = vsel %vm871_vm2, %v872_v7, %v870_v10  ;;  %v2811_v46 = vmul.f32 %v2776_v5, %v2776_v5  ;;  %v2816_v38 = vrot.slane %v1193_v44, %v1131_v63 }
 0x1eb   :  { %2100 = vtanh.f32 %v898_v41  ;;  %v877_v17 = vsel %vm876_vm1, %v2726_v28, %v875_v4  ;;  %v903_v30 = vmax.f32 %v873_v20, 1e-15  ;;  %v886_v28 = vand.u32 2147483648, %v2741_v15 }
 0x1ec   :  { %2102 = vrcp.f32 %v898_v41  ;;  %v880_v25 = vsel %vm878_vm3, %v879_v18, %v877_v17  ;;  %v2824_v56 = vmul.f32 %v2804_v42, %v2811_v46 }
 0x1ed   :  { %2104 = vtanh.f32 %v900_v55  ;;  %v904_v33 = vmax.f32 %v880_v25, 1e-15 }
 0x1ee   :  { %v2087_v6 = vpop.eup %2086  ;;  %2106 = vrcp.f32 %v900_v55 }
 0x1ef   :  { %v2781_v12 = vpop.eup %2088  ;;  %v882_v21 = vmul.f32 %v2087_v6, %v2741_v15  ;;  %2108 = vtanh.f32 %v899_v14 }
 0x1f0   :  { %v2091_v9 = vpop.eup %2090  ;;  %2110 = vtanh.f32 %v901_v16  ;;  %v920_v54 = vmul.f32 %v2781_v12, %v2776_v5 }
 0x1f1   :  { %v2093_v22 = vpop.eup %2092  ;;  %v889_v26 = vmul.f32 %v2091_v9, %v2748_v27  ;;  %v884_v31 = vsel %vm883_vm4, %v2741_v15, %v882_v21  ;;  %2112 = vtanh.f32 %v902_v19  ;;  %v2807_v15 = vrot.slane %v1234_v1, %v1131_v63 }
 0x1f2   :  { %v2095_v24 = vpop.eup %2094  ;;  %2114 = vrcp.f32 %v899_v14  ;;  %v2799_v37 = vsel %vm885_vm6, %v886_v28, %v884_v31  ;;  %v944_v49 = vmul.f32 %v2093_v22, %v2093_v22  ;;  %v242_v31 = vld [vmem:[%s3221_s4] sm:$0xff] }
 0x1f3   :  { %v2097_v23 = vpop.eup %2096  ;;  %v891_v35 = vsel %vm890_vm5, %v2748_v27, %v889_v26  ;;  %2116 = vrcp.f32 %v902_v19  ;;  %v905_v48 = vmax.f32 %v2799_v37, 1e-15  ;;  %v922_v53 = vmul.f32 %v2095_v24, %v2093_v22  ;;  %1951 = vmatprep.mubr.msk.f32.mxu1 %vm1515_vm8, %v242_v31 }
 0x1f4   :  { %v2099_v34 = vpop.eup %2098  ;;  %2118 = vtanh.f32 %v903_v30  ;;  %v894_v45 = vsel %vm892_vm7, %v893_v39, %v891_v35  ;;  %v2814_v50 = vmul.f32 %v2097_v23, %v2097_v23  ;;  %v2828_v58 = vmul.f32 %v2807_v15, %v2811_v46 }
 0x1f5   :  { %v2101_v36 = vpop.eup %2100  ;;  %2120 = vrcp.f32 %v901_v16  ;;  %v906_v29 = vmax.f32 %v894_v45, 1e-15  ;;  %v2831_v41 = vmul.f32 %v2804_v42, %v944_v49  ;;  %v2834_v60 = vmul.f32 %v2807_v15, %v944_v49 }
 0x1f6   :  { %v2103_v40 = vpop.eup %2102  ;;  %2122 = vtanh.f32 %v904_v33  ;;  %v2818_v51 = vmul.f32 %v2101_v36, %v2101_v36  ;;  %v924_v62 = vmul.f32 %v2099_v34, %v2097_v23  ;;  %v2842_v0 = vmul.f32 %v2804_v42, %v2814_v50 }
 0x1f7   :  { %v2105_v47 = vpop.eup %2104  ;;  %2124 = vrcp.f32 %v903_v30  ;;  %v2846_v2 = vmul.f32 %v2807_v15, %v2814_v50  ;;  %v926_v55 = vmul.f32 %v2103_v40, %v2101_v36 }
 0x1f8   :  { %v2107_v27 = vpop.eup %2106  ;;  %2126 = vrcp.f32 %v904_v33  ;;  %v2836_v43 = vmul.f32 %v2105_v47, %v2105_v47  ;;  %v2852_v57 = vmul.f32 %v2804_v42, %v2818_v51  ;;  %v2858_v12 = vmul.f32 %v2807_v15, %v2818_v51 }
 0x1f9   :  { %v2109_v32 = vpop.eup %2108  ;;  %2128 = vtanh.f32 %v905_v48  ;;  %v2862_v16 = vmul.f32 %v2107_v27, %v2105_v47  ;;  %v2232_v47 = vmov 1  }
 0x1fa   :  { %v2111_v52 = vpop.eup %2110  ;;  %v2848_v3 = vmul.f32 %v2109_v32, %v2109_v32  ;;  %2130 = vtanh.f32 %v906_v29  ;;  %v2866_v17 = vmul.f32 %v2804_v42, %v2836_v43  ;;  %v2870_v18 = vmul.f32 %v2807_v15, %v2836_v43  ;;  %2013 = vset.pattern.permute.xlu1 %v2232_v47  ;;  %2012 = vset.pattern.permute.xlu0 %v2232_v47 }
 0x1fb   :  { %v2113_v59 = vpop.eup %2112  ;;  %v2854_v6 = vmul.f32 %v2111_v52, %v2111_v52  ;;  %2132 = vrcp.f32 %v906_v29 }
 0x1fc   :  { %v2115_v61 = vpop.eup %2114  ;;  %v2860_v14 = vmul.f32 %v2113_v59, %v2113_v59  ;;  %v2876_v22 = vmul.f32 %v2804_v42, %v2848_v3  ;;  %v2880_v24 = vmul.f32 %v2807_v15, %v2848_v3  ;;  %2134 = vrcp.f32 %v905_v48 }
 0x1fd   :  { %v2117_v4 = vpop.eup %2116  ;;  %v2872_v21 = vmul.f32 %v2115_v61, %v2109_v32  ;;  %v2884_v30 = vmul.f32 %v2804_v42, %v2854_v6  ;;  %v2899_v28 = vmul.f32 %v2807_v15, %v2854_v6 }
 0x1fe   :  { %v2119_v8 = vpop.eup %2118  ;;  %v2891_v1 = vmul.f32 %v2117_v4, %v2113_v59  ;;  %v2895_v33 = vmul.f32 %v2804_v42, %v2860_v14  ;;  %v2904_v36 = vmul.f32 %v2807_v15, %v2860_v14 }
 0x1ff   :  { %v2121_v7 = vpop.eup %2120  ;;  %v2886_v23 = vmul.f32 %v2119_v8, %v2119_v8 }
 0x200   :  { %v2123_v19 = vpop.eup %2122  ;;  %v2908_v44 = vmul.f32 %v2121_v7, %v2111_v52 }
 0x201   :  { %v1911_v5 = vpop.f32.mrb[24].mxu1  ;;  %v2125_v25 = vpop.eup %2124  ;;  %v2906_v39 = vmul.f32 %v2123_v19, %v2123_v19 }
 0x202   :  { %v1081_v10 = vmul.f32 %v1911_v5, %v922_v53  ;;  %v1021_v11 = vpop.f32.mrb[25].mxu1  ;;  %v2127_v34 = vpop.eup %2126  ;;  %v2910_v45 = vmul.f32 %v2125_v25, %v2119_v8  ;;  %v2917_v53 = vmul.f32 %v2804_v42, %v2886_v23 }
 0x203   :  { %v1080_v9 = vmul.f32 %v1021_v11, %v920_v54  ;;  %v2912_v27 = vpop.eup %2128  ;;  %v2921_v54 = vmul.f32 %v2807_v15, %v2886_v23  ;;  %v2925_v4 = vmul.f32 %v2127_v34, %v2123_v19  ;;  %v2929_v7 = vmul.f32 %v2804_v42, %v2906_v39 }
 0x204   :  { %v1093_v20 = vmul.f32 2.0, %v1081_v10  ;;  %v2131_v5 = vpop.eup %2130 }
 0x205   :  { %v1092_v26 = vmul.f32 2.0, %v1080_v9 }
 0x206   :  { %v1105_v63 = vadd.f32 1.0, %v1093_v20  ;;  %v2133_v20 = vpop.eup %2132 }
 0x207   :  { %v1104_v35 = vadd.f32 1.0, %v1092_v26 }
 0x208   :  { %v1117_v40 = vadd.f32 %v1105_v63, %v944_v49 }
 0x209   :  { %v1116_v32 = vadd.f32 %v1104_v35, %v2811_v46  ;;  %v1914_v29 = vpop.f32.mrb[26].mxu1  ;;  %v1145_v31 = vadd.f32 %v2824_v56, %v1104_v35 }
 0x20a   :  { %v1170_v49 = vmul.f32 %v1117_v40, %v1117_v40  ;;  %v1195_v52 = vmul.f32 %v1117_v40, %v1081_v10  ;;  %v1083_v59 = vmul.f32 %v1914_v29, %v926_v55  ;;  %v1031_v61 = vpop.f32.mrb[27].mxu1  ;;  %v2935_v55 = vmul.f32 %v2912_v27, %v2912_v27 }
 0x20b   :  { %v1169_v46 = vmul.f32 %v1116_v32, %v1116_v32  ;;  %v1194_v8 = vmul.f32 %v1116_v32, %v1080_v9  ;;  %v1082_v11 = vmul.f32 %v1031_v61, %v924_v62  ;;  %v1146_v10 = vadd.f32 %v2831_v41, %v1105_v63 }
 0x20c   :  { %v1182_v25 = vmul.f32 %v1170_v49, %v2804_v42  ;;  %v1211_v37 = vmul.f32 %v2816_v38, %v1195_v52  ;;  %v1095_v48 = vmul.f32 2.0, %v1083_v59  ;;  %v2943_v40 = vmul.f32 %v2807_v15, %v2906_v39 }
 0x20d   :  { %v1181_v19 = vmul.f32 %v1169_v46, %v2804_v42  ;;  %v1210_v62 = vmul.f32 %v2816_v38, %v1194_v8  ;;  %v1094_v9 = vmul.f32 2.0, %v1082_v11  ;;  %v2945_v29 = vmul.f32 %v2133_v20, %v2131_v5 }
 0x20e   :  { %v1223_v26 = vadd.f32 %v1211_v37, %v1182_v25  ;;  %v1107_v34 = vadd.f32 1.0, %v1095_v48  ;;  %v2947_v49 = vmul.f32 %v2131_v5, %v2131_v5  ;;  %v2954_v56 = vmul.f32 %v2804_v42, %v2935_v55  ;;  %v2135_v37 = vpop.eup %2134 }
 0x20f   :  { %v1222_v47 = vadd.f32 %v1210_v62, %v1181_v19  ;;  %v1106_v32 = vadd.f32 1.0, %v1094_v9  ;;  %v1158_v35 = vmax.f32 %v1146_v10, 1e-15  ;;  %v2960_v5 = vmul.f32 %v2807_v15, %v2935_v55 }
 0x210   :  { %v1252_v41 = vadd.f32 %v2834_v60, %v1223_v26  ;;  %v1119_v63 = vadd.f32 %v1107_v34, %v2818_v51  ;;  %v1148_v52 = vadd.f32 %v2852_v57, %v1107_v34  ;;  %v1157_v20 = vmax.f32 %v1145_v31, 1e-15 }
 0x211   :  { %v1251_v61 = vadd.f32 %v2828_v58, %v1222_v47  ;;  %v1118_v46 = vadd.f32 %v1106_v32, %v2814_v50  ;;  %v1917_v8 = vpop.f32.mrb[28].mxu1  ;;  %v1147_v51 = vadd.f32 %v2842_v0, %v1106_v32 }
 0x212   :  { %v1172_v60 = vmul.f32 %v1119_v63, %v1119_v63  ;;  %v1197_v25 = vmul.f32 %v1119_v63, %v1083_v59  ;;  %v1041_v57 = vpop.f32.mrb[29].mxu1  ;;  %v2963_v48 = vmax.f32 %v1252_v41, 0.0  ;;  %v1160_v62 = vmax.f32 %v1148_v52, 1e-15 }
 0x213   :  { %v2965_v19 = vmax.f32 %v1251_v61, 0.0  ;;  %v1171_v10 = vmul.f32 %v1118_v46, %v1118_v46  ;;  %v1196_v58 = vmul.f32 %v1118_v46, %v1082_v11  ;;  %v1085_v26 = vmul.f32 %v1917_v8, %v2862_v16 }
 0x214   :  { %v1184_v50 = vmul.f32 %v1172_v60, %v2804_v42  ;;  %v1213_v9 = vmul.f32 %v2816_v38, %v1197_v25  ;;  %v1084_v31 = vmul.f32 %v1041_v57, %v2872_v21  ;;  %v2976_v11 = vmul.f32 %v2804_v42, %v2947_v49 }
 0x215   :  { %2136 = vrsqrt.f32 %v2965_v19  ;;  %v1183_v59 = vmul.f32 %v1171_v10, %v2804_v42  ;;  %v1212_v0 = vmul.f32 %v2816_v38, %v1196_v58  ;;  %v1097_v47 = vmul.f32 2.0, %v1085_v26 }
 0x216   :  { %2138 = vrcp.f32 %v1158_v35  ;;  %v1225_v34 = vadd.f32 %v1213_v9, %v1184_v50  ;;  %v1096_v41 = vmul.f32 2.0, %v1084_v31  ;;  %v2980_v16 = vmul.f32 %v2807_v15, %v2947_v49 }
 0x217   :  { %2140 = vrcp.f32 %v1157_v20  ;;  %v1224_v32 = vadd.f32 %v1212_v0, %v1183_v59  ;;  %v1159_v52 = vmax.f32 %v1147_v51, 1e-15  ;;  %v1109_v21 = vadd.f32 1.0, %v1097_v47 }
 0x218   :  { %2142 = vrsqrt.f32 %v2963_v48  ;;  %v1254_v63 = vadd.f32 %v2858_v12, %v1225_v34  ;;  %v1108_v61 = vadd.f32 1.0, %v1096_v41  ;;  %v2986_v8 = vmul.f32 %v2135_v37, %v2912_v27 }
 0x219   :  { %2144 = vrcp.f32 %v1160_v62  ;;  %v1253_v35 = vadd.f32 %v2846_v2, %v1224_v32  ;;  %v1920_v46 = vpop.f32.mrb[30].mxu1  ;;  %v1121_v60 = vadd.f32 %v1109_v21, %v2836_v43  ;;  %v1150_v15 = vadd.f32 %v2866_v17, %v1109_v21 }
 0x21a   :  { %v2988_v20 = vmax.f32 %v1254_v63, 0.0  ;;  %v1087_v25 = vmul.f32 %v1920_v46, %v2891_v1  ;;  %v1051_v57 = vpop.f32.mrb[31].mxu1  ;;  %v1120_v51 = vadd.f32 %v1108_v61, %v2848_v3  ;;  %v1149_v2 = vadd.f32 %v2876_v22, %v1108_v61 }
 0x21b   :  { %v2993_v12 = vmax.f32 %v1253_v35, 0.0  ;;  %v1086_v10 = vmul.f32 %v1051_v57, %v2908_v44  ;;  %2146 = vrcp.f32 %v1159_v52  ;;  %v1162_v27 = vmax.f32 %v1150_v15, 1e-15 }
 0x21c   :  { %v1174_v37 = vmul.f32 %v1121_v60, %v1121_v60  ;;  %v1199_v58 = vmul.f32 %v1121_v60, %v1085_v26  ;;  %v1161_v62 = vmax.f32 %v1149_v2, 1e-15  ;;  %v1173_v50 = vmul.f32 %v1120_v51, %v1120_v51 }
 0x21d   :  { %v1198_v43 = vmul.f32 %v1120_v51, %v1084_v31  ;;  %v1280_v17 = vand.u32 2147483648, %v2965_v19  ;;  %2148 = vrsqrt.f32 %v2988_v20  ;;  %v1099_v3 = vmul.f32 2.0, %v1087_v25 }
 0x21e   :  { %v1186_v1 = vmul.f32 %v1174_v37, %v2804_v42  ;;  %v1215_v9 = vmul.f32 %v2816_v38, %v1199_v58  ;;  %2150 = vrsqrt.f32 %v2993_v12  ;;  %v1185_v22 = vmul.f32 %v1173_v50, %v2804_v42 }
 0x21f   :  { %v2137_v59 = vpop.eup %2136  ;;  %v1214_v44 = vmul.f32 %v2816_v38, %v1198_v43  ;;  %v1098_v26 = vmul.f32 2.0, %v1086_v10  ;;  %2152 = vrcp.f32 %v1162_v27  ;;  %v1111_v34 = vadd.f32 1.0, %v1099_v3 }
 0x220   :  { %v3005_v0 = vpop.eup %2138  ;;  %v1227_v31 = vadd.f32 %v1215_v9, %v1186_v1  ;;  %vm1277_vm9 = vcmp.eq.f32.partialorder %v2965_v19, inf  ;;  %v1287_v47 = vand.u32 2147483648, %v2963_v48  ;;  %2154 = vrcp.f32 %v1161_v62 }
 0x221   :  { %v3009_v32 = vpop.eup %2140  ;;  %v1226_v41 = vadd.f32 %v1214_v44, %v1185_v22  ;;  %v1110_v63 = vadd.f32 1.0, %v1098_v26  ;;  %v1923_v52 = vpop.f32.mrb[32].mxu1  ;;  %v1276_v21 = vmul.f32 %v2137_v59, %v2965_v19  ;;  %v1123_v46 = vadd.f32 %v1111_v34, %v2860_v14 }
 0x222   :  { %v2143_v35 = vpop.eup %2142  ;;  %v1256_v61 = vadd.f32 %v2870_v18, %v1227_v31  ;;  %v1152_v60 = vadd.f32 %v2895_v33, %v1111_v34  ;;  %v1089_v15 = vmul.f32 %v1923_v52, %v2925_v4  ;;  %v1061_v57 = vpop.f32.mrb[33].mxu1  ;;  %vm1279_vm10 = vcmp.eq.f32.partialorder %v2965_v19, 0.0 }
 0x223   :  { %v3016_v51 = vpop.eup %2144  ;;  %v1255_v2 = vadd.f32 %v2880_v24, %v1226_v41  ;;  %v1122_v27 = vadd.f32 %v1110_v63, %v2854_v6  ;;  %v1151_v37 = vadd.f32 %v2884_v30, %v1110_v63  ;;  %v1088_v58 = vmul.f32 %v1061_v57, %v2910_v45 }
 0x224   :  { %v3023_v18 = vmax.f32 %v1256_v61, 0.0  ;;  %v1164_v14 = vmax.f32 %v1152_v60, 1e-15  ;;  %v1176_v62 = vmul.f32 %v1123_v46, %v1123_v46  ;;  %v1201_v33 = vmul.f32 %v1123_v46, %v1087_v25 }
 0x225   :  { %v3025_v50 = vmax.f32 %v1255_v2, 0.0  ;;  %v1163_v4 = vmax.f32 %v1151_v37, 1e-15  ;;  %v1175_v43 = vmul.f32 %v1122_v27, %v1122_v27  ;;  %v1200_v1 = vmul.f32 %v1122_v27, %v1086_v10  ;;  %v3027_v9 = vpop.eup %2146 }
 0x226   :  { %2156 = vrsqrt.f32 %v3023_v18  ;;  %v1188_v6 = vmul.f32 %v1176_v62, %v2804_v42  ;;  %v1217_v24 = vmul.f32 %v2816_v38, %v1201_v33  ;;  %v1101_v30 = vmul.f32 2.0, %v1089_v15 }
 0x227   :  { %2158 = vrsqrt.f32 %v3025_v50  ;;  %v1187_v45 = vmul.f32 %v1175_v43, %v2804_v42  ;;  %v1216_v25 = vmul.f32 %v2816_v38, %v1200_v1  ;;  %v1100_v3 = vmul.f32 2.0, %v1088_v58  ;;  %v3036_v59 = vpop.eup %2148 }
 0x228   :  { %vm1284_vm11 = vcmp.eq.f32.partialorder %v2963_v48, inf  ;;  %v1229_v10 = vadd.f32 %v1217_v24, %v1188_v6  ;;  %2160 = vrcp.f32 %v1164_v14  ;;  %v1113_v22 = vadd.f32 1.0, %v1101_v30  ;;  %v3040_v26 = vpop.eup %2150 }
 0x229   :  { %v1283_v44 = vmul.f32 %v2143_v35, %v2963_v48  ;;  %vm1286_vm12 = vcmp.eq.f32.partialorder %v2963_v48, 0.0  ;;  %v1228_v31 = vadd.f32 %v1216_v25, %v1187_v45  ;;  %2162 = vrcp.f32 %v1163_v4  ;;  %v1926_v41 = vpop.f32.mrb[34].mxu1  ;;  %v3045_v52 = vpop.eup %2152 }
 0x22a   :  { %v1112_v34 = vadd.f32 1.0, %v1100_v3  ;;  %v1278_v63 = vsel %vm1277_vm9, %v2965_v19, %v1276_v21  ;;  %v1258_v61 = vadd.f32 %v2904_v36, %v1229_v10  ;;  %v1125_v46 = vadd.f32 %v1113_v22, %v2906_v39  ;;  %v1071_v57 = vpop.f32.mrb[35].mxu1  ;;  %v3051_v2 = vpop.eup %2154 }
 0x22b   :  { %v1154_v35 = vadd.f32 %v2929_v7, %v1113_v22  ;;  %v1091_v60 = vmul.f32 %v1926_v41, %v2945_v29  ;;  %v1257_v27 = vadd.f32 %v2899_v28, %v1228_v31  ;;  %v1090_v21 = vmul.f32 %v1071_v57, %v2986_v8 }
 0x22c   :  { %v1124_v37 = vadd.f32 %v1112_v34, %v2886_v23  ;;  %v1153_v14 = vadd.f32 %v2917_v53, %v1112_v34  ;;  %v3057_v62 = vmax.f32 %v1258_v61, 0.0  ;;  %v1178_v36 = vmul.f32 %v1125_v46, %v1125_v46 }
 0x22d   :  { %v1203_v33 = vmul.f32 %v1125_v46, %v1089_v15  ;;  %v1281_v39 = vsel %vm1279_vm10, %v1280_v17, %v1278_v63  ;;  %v3063_v7 = vmax.f32 %v1257_v27, 0.0  ;;  %v1166_v29 = vmax.f32 %v1154_v35, 1e-15 }
 0x22e   :  { %v1177_v4 = vmul.f32 %v1124_v37, %v1124_v37  ;;  %v1202_v28 = vmul.f32 %v1124_v37, %v1088_v58  ;;  %v1190_v23 = vmul.f32 %v1178_v36, %v2804_v42  ;;  %v1165_v43 = vmax.f32 %v1153_v14, 1e-15 }
 0x22f   :  { %v1219_v53 = vmul.f32 %v2816_v38, %v1203_v33  ;;  %v1103_v8 = vmul.f32 2.0, %v1091_v60  ;;  %2164 = vrsqrt.f32 %v3057_v62  ;;  %v1102_v6 = vmul.f32 2.0, %v1090_v21 }
 0x230   :  { %v1189_v15 = vmul.f32 %v1177_v4, %v2804_v42  ;;  %v1218_v1 = vmul.f32 %v2816_v38, %v1202_v28  ;;  %v3070_v19 = vpop.eup %2156  ;;  %2166 = vrsqrt.f32 %v3063_v7  ;;  %v1285_v58 = vsel %vm1284_vm11, %v2963_v48, %v1283_v44 }
 0x231   :  { %v1231_v17 = vadd.f32 %v1219_v53, %v1190_v23  ;;  %v1115_v24 = vadd.f32 1.0, %v1103_v8  ;;  %v3076_v30 = vpop.eup %2158  ;;  %2168 = vrcp.f32 %v1166_v29  ;;  %v1114_v25 = vadd.f32 1.0, %v1102_v6 }
 0x232   :  { %v1230_v45 = vadd.f32 %v1218_v1, %v1189_v15  ;;  %v1288_v3 = vsel %vm1286_vm12, %v1287_v47, %v1285_v58  ;;  %vm1291_vm13 = vcmp.eq.f32.partialorder %v2993_v12, inf  ;;  %v3083_v10 = vpop.eup %2160  ;;  %v1360_v34 = vmul.f32 %v3009_v32, %v1281_v39 }
 0x233   :  { %v1260_v22 = vadd.f32 %v2943_v40, %v1231_v17  ;;  %v1127_v31 = vadd.f32 %v1115_v24, %v2947_v49  ;;  %v3088_v44 = vadd.f32 %v2976_v11, %v1115_v24  ;;  %vm1293_vm14 = vcmp.eq.f32.partialorder %v2993_v12, 0.0  ;;  %v3092_v41 = vpop.eup %2162 }
 0x234   :  { %v1259_v48 = vadd.f32 %v2921_v54, %v1230_v45  ;;  %v1126_v47 = vadd.f32 %v1114_v25, %v2935_v55  ;;  %v1155_v63 = vadd.f32 %v2954_v56, %v1114_v25  ;;  %v1362_v61 = vmul.f32 %v3005_v0, %v1288_v3 }
 0x235   :  { %v3098_v40 = vmax.f32 %v1260_v22, 0.0  ;;  %2170 = vrcp.f32 %v1165_v43  ;;  %v1180_v49 = vmul.f32 %v1127_v31, %v1127_v31  ;;  %v1205_v11 = vmul.f32 %v1127_v31, %v1091_v60 }
 0x236   :  { %v3100_v46 = vmax.f32 %v1259_v48, 0.0  ;;  %v1167_v32 = vmax.f32 %v1155_v63, 1e-15  ;;  %v1179_v35 = vmul.f32 %v1126_v47, %v1126_v47  ;;  %v1204_v57 = vmul.f32 %v1126_v47, %v1090_v21 }
 0x237   :  { %v1168_v27 = vmax.f32 %v3088_v44, 1e-15  ;;  %v1192_v54 = vmul.f32 %v1180_v49, %v2804_v42  ;;  %v1221_v55 = vmul.f32 %v2816_v38, %v1205_v11  ;;  %v1383_v37 = vmax.f32 %v1360_v34, 0.0 }
 0x238   :  { %2172 = vrsqrt.f32 %v3098_v40  ;;  %v1191_v56 = vmul.f32 %v1179_v35, %v2804_v42  ;;  %v1220_v0 = vmul.f32 %v2816_v38, %v1204_v57  ;;  %v1384_v14 = vmax.f32 %v1362_v61, 0.0 }
 0x239   :  { %2174 = vrsqrt.f32 %v3100_v46  ;;  %v1233_v60 = vadd.f32 %v1221_v55, %v1192_v54  ;;  %v1395_v36 = vmin.f32 %v1383_v37, 0.999999  ;;  %v1290_v21 = vmul.f32 %v3040_v26, %v2993_v12  ;;  %v3111_v33 = vpop.eup %2164 }
 0x23a   :  { %v1232_v39 = vadd.f32 %v1220_v0, %v1191_v56  ;;  %2176 = vrcp.f32 %v1167_v32  ;;  %v1396_v29 = vmin.f32 %v1384_v14, 0.999999  ;;  %v1294_v4 = vand.u32 2147483648, %v2993_v12  ;;  %v2167_v28 = vpop.eup %2166 }
 0x23b   :  { %v1262_v42 = vadd.f32 %v2980_v16, %v1233_v60  ;;  %v1407_v23 = vadd.f32 1.0, %v1395_v36  ;;  %v1443_v38 = vsub.f32 1.0, %v1395_v36  ;;  %v1292_v53 = vsel %vm1291_vm13, %v2993_v12, %v1290_v21  ;;  %v3118_v43 = vpop.eup %2168 }
 0x23c   :  { %v1261_v26 = vadd.f32 %v2960_v5, %v1232_v39  ;;  %v1408_v8 = vadd.f32 1.0, %v1396_v29  ;;  %v1444_v15 = vsub.f32 1.0, %v1396_v29  ;;  %v1295_v1 = vsel %vm1293_vm14, %v1294_v4, %v1292_v53 }
 0x23d   :  { %v3123_v6 = vmax.f32 %v1262_v42, 0.0  ;;  %2178 = vlog2.f32 %v1407_v23  ;;  %v1297_v16 = vmul.f32 %v3036_v59, %v2988_v20  ;;  %vm1298_vm15 = vcmp.eq.f32.partialorder %v2988_v20, inf }
 0x23e   :  { %v3128_v17 = vmax.f32 %v1261_v26, 0.0  ;;  %2180 = vlog2.f32 %v1408_v8  ;;  %vm1300_vm0 = vcmp.eq.f32.partialorder %v2988_v20, 0.0  ;;  %v1301_v5 = vand.u32 2147483648, %v2988_v20 }
 0x23f   :  { %v3132_v24 = vpop.eup %2170  ;;  %2182 = vrsqrt.f32 %v3123_v6  ;;  %v1299_v12 = vsel %vm1298_vm15, %v2988_v20, %v1297_v16  ;;  %v1364_v58 = vmul.f32 %v3027_v9, %v1295_v1  ;;  %v1304_v59 = vmul.f32 %v3076_v30, %v3025_v50 }
 0x240   :  { %2184 = vrsqrt.f32 %v3128_v17  ;;  %v1302_v45 = vsel %vm1300_vm0, %v1301_v5, %v1299_v12  ;;  %vm1305_vm1 = vcmp.eq.f32.partialorder %v3025_v50, inf  ;;  %vm1307_vm2 = vcmp.eq.f32.partialorder %v3025_v50, 0.0 }
 0x241   :  { %2186 = vlog2.f32 %v1443_v38  ;;  %v1366_v25 = vmul.f32 %v3016_v51, %v1302_v45  ;;  %v1385_v3 = vmax.f32 %v1364_v58, 0.0  ;;  %v1306_v22 = vsel %vm1305_vm1, %v3025_v50, %v1304_v59 }
 0x242   :  { %v3144_v31 = vpop.eup %2172  ;;  %2188 = vlog2.f32 %v1444_v15  ;;  %v1308_v20 = vand.u32 2147483648, %v3025_v50  ;;  %v1311_v9 = vmul.f32 %v3070_v19, %v3023_v18  ;;  %vm1312_vm3 = vcmp.eq.f32.partialorder %v3023_v18, inf }
 0x243   :  { %v2175_v30 = vpop.eup %2174  ;;  %v1386_v34 = vmax.f32 %v1366_v25, 0.0  ;;  %v1397_v48 = vmin.f32 %v1385_v3, 0.999999  ;;  %vm1314_vm4 = vcmp.eq.f32.partialorder %v3023_v18, 0.0  ;;  %v1315_v51 = vand.u32 2147483648, %v3023_v18 }
 0x244   :  { %v3152_v47 = vpop.eup %2176  ;;  %v1309_v63 = vsel %vm1307_vm2, %v1308_v20, %v1306_v22  ;;  %v1313_v61 = vsel %vm1312_vm3, %v3023_v18, %v1311_v9  ;;  %v1318_v49 = vmul.f32 %v2167_v28, %v3063_v7  ;;  %vm1319_vm5 = vcmp.eq.f32.partialorder %v3063_v7, inf }
 0x245   :  { %v1398_v19 = vmin.f32 %v1386_v34, 0.999999  ;;  %v1409_v11 = vadd.f32 1.0, %v1397_v48  ;;  %v1445_v32 = vsub.f32 1.0, %v1397_v48  ;;  %v1316_v35 = vsel %vm1314_vm4, %v1315_v51, %v1313_v61 }
 0x246   :  { %v1368_v57 = vmul.f32 %v3051_v2, %v1309_v63  ;;  %v1370_v54 = vmul.f32 %v3045_v52, %v1316_v35  ;;  %v1320_v55 = vsel %vm1319_vm5, %v3063_v7, %v1318_v49  ;;  %vm1321_vm6 = vcmp.eq.f32.partialorder %v3063_v7, 0.0 }
 0x247   :  { %v2179_v50 = vpop.eup %2178  ;;  %v1410_v37 = vadd.f32 1.0, %v1398_v19  ;;  %2190 = vlog2.f32 %v1409_v11  ;;  %v1446_v18 = vsub.f32 1.0, %v1398_v19  ;;  %v1322_v56 = vand.u32 2147483648, %v3063_v7 }
 0x248   :  { %v2181_v0 = vpop.eup %2180  ;;  %v1420_v14 = vmul.f32 0.6931472, %v2179_v50  ;;  %2192 = vlog2.f32 %v1445_v32  ;;  %v1387_v60 = vmax.f32 %v1368_v57, 0.0  ;;  %v1388_v36 = vmax.f32 %v1370_v54, 0.0 }
 0x249   :  { %v3164_v21 = vpop.eup %2182  ;;  %v1422_v2 = vmul.f32 0.6931472, %v2181_v0  ;;  %2194 = vlog2.f32 %v1410_v37  ;;  %v1323_v52 = vsel %vm1321_vm6, %v1322_v56, %v1320_v55  ;;  %v1325_v39 = vmul.f32 %v3111_v33, %v3057_v62 }
 0x24a   :  { %v3168_v29 = vpop.eup %2184  ;;  %2196 = vlog2.f32 %v1446_v18  ;;  %v1399_v4 = vmin.f32 %v1387_v60, 0.999999  ;;  %v1400_v28 = vmin.f32 %v1388_v36, 0.999999  ;;  %vm1326_vm7 = vcmp.eq.f32.partialorder %v3057_v62, inf }
 0x24b   :  { %v2187_v7 = vpop.eup %2186  ;;  %v1327_v42 = vsel %vm1326_vm7, %v3057_v62, %v1325_v39  ;;  %vm1328_vm9 = vcmp.eq.f32.partialorder %v3057_v62, 0.0  ;;  %v1329_v23 = vand.u32 2147483648, %v3057_v62  ;;  %v1372_v38 = vmul.f32 %v3092_v41, %v1323_v52 }
 0x24c   :  { %v2189_v53 = vpop.eup %2188  ;;  %v1456_v26 = vmul.f32 0.6931472, %v2187_v7  ;;  %v1411_v8 = vadd.f32 1.0, %v1399_v4  ;;  %v1412_v33 = vadd.f32 1.0, %v1400_v28  ;;  %v1447_v15 = vsub.f32 1.0, %v1399_v4 }
 0x24d   :  { %v1458_v1 = vmul.f32 0.6931472, %v2189_v53  ;;  %v1448_v16 = vsub.f32 1.0, %v1400_v28  ;;  %v1330_v5 = vsel %vm1328_vm9, %v1329_v23, %v1327_v42  ;;  %v1389_v12 = vmax.f32 %v1372_v38, 0.0 }
 0x24e   :  { %v1479_v58 = vsub.f32 %v1420_v14, %v1456_v26  ;;  %2198 = vlog2.f32 %v1411_v8  ;;  %v1374_v59 = vmul.f32 %v3083_v10, %v1330_v5  ;;  %v1332_v45 = vmul.f32 %v2175_v30, %v3100_v46 }
 0x24f   :  { %v1480_v25 = vsub.f32 %v1422_v2, %v1458_v1  ;;  %2200 = vlog2.f32 %v1412_v33  ;;  %v1401_v62 = vmin.f32 %v1389_v12, 0.999999  ;;  %vm1333_vm10 = vcmp.eq.f32.partialorder %v3100_v46, inf }
 0x250   :  { %v1491_v41 = vmul.f32 0.5, %v1479_v58  ;;  %2202 = vlog2.f32 %v1447_v15  ;;  %v1390_v3 = vmax.f32 %v1374_v59, 0.0  ;;  %v1334_v22 = vsel %vm1333_vm10, %v3100_v46, %v1332_v45 }
 0x251   :  { %v2191_v20 = vpop.eup %2190  ;;  %v1492_v9 = vmul.f32 0.5, %v1480_v25  ;;  %2204 = vlog2.f32 %v1448_v16  ;;  %v1413_v34 = vadd.f32 1.0, %v1401_v62  ;;  %v1449_v48 = vsub.f32 1.0, %v1401_v62 }
 0x252   :  { %v2193_v51 = vpop.eup %2192  ;;  %v1503_v63 = vmul.f32 2.0, %v1491_v41  ;;  %v1424_v10 = vmul.f32 0.6931472, %v2191_v20  ;;  %v1402_v61 = vmin.f32 %v1390_v3, 0.999999  ;;  %vm1335_vm11 = vcmp.eq.f32.partialorder %v3100_v46, 0.0 }
 0x253   :  { %v2195_v30 = vpop.eup %2194  ;;  %v1504_v49 = vmul.f32 2.0, %v1492_v9  ;;  %v1460_v19 = vmul.f32 0.6931472, %v2193_v51  ;;  %2206 = vlog2.f32 %v1413_v34  ;;  %v1336_v11 = vand.u32 2147483648, %v3100_v46 }
 0x254   :  { %v2197_v32 = vpop.eup %2196  ;;  %v1426_v35 = vmul.f32 0.6931472, %v2195_v30  ;;  %v1414_v57 = vadd.f32 1.0, %v1402_v61  ;;  %v1450_v54 = vsub.f32 1.0, %v1402_v61  ;;  %2208 = vlog2.f32 %v1449_v48 }
 0x255   :  { %v1986_v55 = vpack.c.bf16 %v1504_v49, %v1503_v63  ;;  %v1462_v50 = vmul.f32 0.6931472, %v2197_v32  ;;  %v1481_v37 = vsub.f32 %v1424_v10, %v1460_v19  ;;  %v1337_v18 = vsel %vm1335_vm11, %v1336_v11, %v1334_v22 }
 0x256   :  { %2210 = vlog2.f32 %v1414_v57  ;;  %v1339_v56 = vmul.f32 %v3144_v31, %v3098_v40  ;;  %vm1340_vm12 = vcmp.eq.f32.partialorder %v3098_v40, inf  ;;  %vm1342_vm13 = vcmp.eq.f32.partialorder %v3098_v40, 0.0 }
 0x257   :  { %1987 = vmatprep.subr.bf16.mxu1 %v1986_v55  ;;  %v1482_v0 = vsub.f32 %v1426_v35, %v1462_v50  ;;  %v1493_v46 = vmul.f32 0.5, %v1481_v37  ;;  %2212 = vlog2.f32 %v1450_v54  ;;  %v1343_v14 = vand.u32 2147483648, %v3098_v40 }
 0x258   :  { %v2199_v60 = vpop.eup %2198  ;;  %1989 = vmatpush3.bf16.msra.mxu1 %v1986_v55  ;;  %v1341_v36 = vsel %vm1340_vm12, %v3098_v40, %v1339_v56  ;;  %v1376_v2 = vmul.f32 %v3132_v24, %v1337_v18  ;;  %v1346_v52 = vmul.f32 %v3168_v29, %v3128_v17  ;;  %vm1347_vm14 = vcmp.eq.f32.partialorder %v3128_v17, inf }
 0x259   :  { %v2201_v31 = vpop.eup %2200  ;;  %v1494_v39 = vmul.f32 0.5, %v1482_v0  ;;  %v1505_v4 = vmul.f32 2.0, %v1493_v46  ;;  %v1428_v28 = vmul.f32 0.6931472, %v2199_v60  ;;  %v1344_v7 = vsel %vm1342_vm13, %v1343_v14, %v1341_v36 }
 0x25a   :  { %v2203_v42 = vpop.eup %2202  ;;  %v1430_v23 = vmul.f32 0.6931472, %v2201_v31  ;;  %v1378_v38 = vmul.f32 %v3118_v43, %v1344_v7  ;;  %v1391_v53 = vmax.f32 %v1376_v2, 0.0  ;;  %v1348_v26 = vsel %vm1347_vm14, %v3128_v17, %v1346_v52 }
 0x25b   :  { %v2205_v24 = vpop.eup %2204  ;;  %2214 = vrcp.f32 %v1168_v27  ;;  %v1506_v29 = vmul.f32 2.0, %v1494_v39  ;;  %v1464_v8 = vmul.f32 0.6931472, %v2203_v42  ;;  %v1350_v33 = vand.u32 2147483648, %v3128_v17 }
 0x25c   :  { %v1466_v15 = vmul.f32 0.6931472, %v2205_v24  ;;  %v1392_v1 = vmax.f32 %v1378_v38, 0.0  ;;  %v1403_v16 = vmin.f32 %v1391_v53, 0.999999  ;;  %vm1349_vm15 = vcmp.eq.f32.partialorder %v3128_v17, 0.0 }
 0x25d   :  { %v2207_v40 = vpop.eup %2206  ;;  %v1990_v5 = vpack.c.bf16 %v1506_v29, %v1505_v4  ;;  %v1483_v12 = vsub.f32 %v1428_v28, %v1464_v8  ;;  %v1351_v43 = vsel %vm1349_vm15, %v1350_v33, %v1348_v26  ;;  %v1353_v58 = vmul.f32 %v3164_v21, %v3123_v6 }
 0x25e   :  { %v2209_v59 = vpop.eup %2208  ;;  %v1484_v45 = vsub.f32 %v1430_v23, %v1466_v15  ;;  %v1432_v44 = vmul.f32 0.6931472, %v2207_v40  ;;  %v1404_v27 = vmin.f32 %v1392_v1, 0.999999  ;;  %v1415_v25 = vadd.f32 1.0, %v1403_v16 }
 0x25f   :  { %1991 = vmatprep.subr.bf16.mxu1 %v1990_v5  ;;  %v1495_v62 = vmul.f32 0.5, %v1483_v12  ;;  %v1468_v41 = vmul.f32 0.6931472, %v2209_v59  ;;  %v1451_v3 = vsub.f32 1.0, %v1403_v16  ;;  %vm1354_vm0 = vcmp.eq.f32.partialorder %v3123_v6, inf }
 0x260   :  { %v2211_v22 = vpop.eup %2210  ;;  %1993 = vmatpush3.bf16.msra.mxu1 %v1990_v5  ;;  %v1496_v17 = vmul.f32 0.5, %v1484_v45  ;;  %v1416_v20 = vadd.f32 1.0, %v1404_v27  ;;  %2216 = vlog2.f32 %v1415_v25  ;;  %v1452_v9 = vsub.f32 1.0, %v1404_v27 }
 0x261   :  { %v2213_v34 = vpop.eup %2212  ;;  %v1507_v48 = vmul.f32 2.0, %v1495_v62  ;;  %v1434_v21 = vmul.f32 0.6931472, %v2211_v22  ;;  %v1485_v51 = vsub.f32 %v1432_v44, %v1468_v41  ;;  %2218 = vlog2.f32 %v1451_v3  ;;  %v243_v41 = vld [vmem:[%s3221_s4 + $0x8] sm:$0xf] }
 0x262   :  { %v1508_v63 = vmul.f32 2.0, %v1496_v17  ;;  %v1470_v10 = vmul.f32 0.6931472, %v2213_v34  ;;  %2220 = vlog2.f32 %v1416_v20  ;;  %v1355_v61 = vsel %vm1354_vm0, %v3123_v6, %v1353_v58 }
 0x263   :  { %v1497_v30 = vmul.f32 0.5, %v1485_v51  ;;  %2222 = vlog2.f32 %v1452_v9  ;;  %v1357_v49 = vand.u32 2147483648, %v3123_v6  ;;  %v1380_v19 = vmul.f32 %v3152_v47, %v1351_v43 }
 0x264   :  { %v1994_v11 = vpack.c.bf16 %v1508_v63, %v1507_v48  ;;  %v1486_v32 = vsub.f32 %v1434_v21, %v1470_v10  ;;  %vm1356_vm1 = vcmp.eq.f32.partialorder %v3123_v6, 0.0  ;;  %v2233_v17 = vmov 0  }
 0x265   :  { %v2215_v35 = vpop.eup %2214  ;;  %v1358_v57 = vsel %vm1356_vm1, %v1357_v49, %v1355_v61  ;;  %v1393_v54 = vmax.f32 %v1380_v19, 0.0  ;;  %v1509_v50 = vmul.f32 2.0, %v1497_v30  ;;  %v1598_v20 = vand.u32 127, %v1129_v13 }
 0x266   :  { %1995 = vmatprep.subr.bf16.mxu1 %v1994_v11  ;;  %v1498_v55 = vmul.f32 0.5, %v1486_v32  ;;  %v1382_v37 = vmul.f32 %v2215_v35, %v1358_v57 }
 0x267   :  { %1997 = vmatpush3.bf16.msra.mxu1 %v1994_v11  ;;  %v1405_v18 = vmin.f32 %v1393_v54, 0.999999  ;;  %vm1600_vm2 = vcmp.eq.s32.totalorder %v1598_v20, 1  ;;  %vm1599_vm3 = vcmp.eq.s32.totalorder %v1598_v20, 0 }
 0x268   :  { %v1510_v56 = vmul.f32 2.0, %v1498_v55  ;;  %v1394_v0 = vmax.f32 %v1382_v37, 0.0 }
 0x269   :  { %v1417_v46 = vadd.f32 1.0, %v1405_v18  ;;  %v1453_v14 = vsub.f32 1.0, %v1405_v18 }
 0x26a   :  { %v2217_v60 = vpop.eup %2216  ;;  %v1998_v36 = vpack.c.bf16 %v1510_v56, %v1509_v50  ;;  %v1406_v47 = vmin.f32 %v1394_v0, 0.999999 }
 0x26b   :  { %v2219_v2 = vpop.eup %2218  ;;  %v1436_v52 = vmul.f32 0.6931472, %v2217_v60  ;;  %2224 = vlog2.f32 %v1417_v46 }
 0x26c   :  { %v2221_v6 = vpop.eup %2220  ;;  %1999 = vmatprep.subr.bf16.mxu1 %v1998_v36  ;;  %v1472_v31 = vmul.f32 0.6931472, %v2219_v2  ;;  %v1418_v39 = vadd.f32 1.0, %v1406_v47  ;;  %v1454_v4 = vsub.f32 1.0, %v1406_v47  ;;  %2226 = vlog2.f32 %v1453_v14 }
 0x26d   :  { %v2223_v28 = vpop.eup %2222  ;;  %2001 = vmatpush3.bf16.msra.mxu1 %v1998_v36  ;;  %v1438_v7 = vmul.f32 0.6931472, %v2221_v6 }
 0x26e   :  { %v1474_v42 = vmul.f32 0.6931472, %v2223_v28  ;;  %v1487_v23 = vsub.f32 %v1436_v52, %v1472_v31  ;;  %2228 = vlog2.f32 %v1418_v39 }
 0x26f   :  { %2230 = vlog2.f32 %v1454_v4 }
 0x270   :  { %v1488_v38 = vsub.f32 %v1438_v7, %v1474_v42  ;;  %v1499_v53 = vmul.f32 0.5, %v1487_v23 }
 0x272   :  { %v1500_v26 = vmul.f32 0.5, %v1488_v38  ;;  %v1511_v24 = vmul.f32 2.0, %v1499_v53 }
 0x274   :  { %v1512_v29 = vmul.f32 2.0, %v1500_v26 }
 0x275   :  { %v2225_v8 = vpop.eup %2224 }
 0x276   :  { %v2227_v33 = vpop.eup %2226  ;;  %v2002_v15 = vpack.c.bf16 %v1512_v29, %v1511_v24  ;;  %v1440_v1 = vmul.f32 0.6931472, %v2225_v8 }
 0x277   :  { %v1476_v16 = vmul.f32 0.6931472, %v2227_v33 }
 0x278   :  { %v2229_v40 = vpop.eup %2228  ;;  %2003 = vmatprep.subr.bf16.mxu1 %v2002_v15 }
 0x279   :  { %v2231_v5 = vpop.eup %2230  ;;  %2005 = vmatpush3.bf16.msra.mxu1 %v2002_v15  ;;  %v1442_v12 = vmul.f32 0.6931472, %v2229_v40  ;;  %v1489_v43 = vsub.f32 %v1440_v1, %v1476_v16 }
 0x27a   :  { %v1478_v58 = vmul.f32 0.6931472, %v2231_v5 }
 0x27b   :  { %v1501_v59 = vmul.f32 0.5, %v1489_v43 }
 0x27c   :  { %v1490_v45 = vsub.f32 %v1442_v12, %v1478_v58 }
 0x27d   :  { %v1513_v27 = vmul.f32 2.0, %v1501_v59 }
 0x27e   :  { %v1502_v44 = vmul.f32 0.5, %v1490_v45 }
 0x280   :  { %v1514_v25 = vmul.f32 2.0, %v1502_v44 }
 0x282   :  { %v2006_v62 = vpack.c.bf16 %v1514_v25, %v1513_v27 }
 0x284   :  { %2007 = vmatprep.subr.bf16.mxu1 %v2006_v62 }
 0x285   :  { %2009 = vmatpush3.bf16.msra.mxu1 %v2006_v62 }
 0x288   :  { %1952 = vmatmul.mubr.msk.f32.vlgmr.msra.gmra.mrb[36].mxu1 %vm1515_vm8, %v243_v41 }
 0x35b   :  { %v1953_v3 = vpop.f32.mrb[36].mxu1 }
 0x35c   :  { %1608 = vperm.xlu1 %2013, %v1953_v3   ;;  %v1588_v22 = vpop.f32.mrb[37].mxu1 }
 0x35d   :  { %1603 = vperm.xlu0 %2012, %v1588_v22  }
 0x360   :  { %2014 = vset.pattern.permute.xlu1 %v2233_v17 }
 0x361   :  { %1614 = vperm.xlu1 %2014, %v1588_v22   ;;  %2015 = vset.pattern.permute.xlu0 %v2233_v17 }
 0x365   :  { %1618 = vperm.xlu1 %2014, %v1953_v3  }
 0x3db   :  { %v1609_v9 = vpop.permute.xlu1 %1608 }
 0x3dc   :  { %v1604_v34 = vpop.permute.xlu0 %1603  ;;  %v1612_v63 = vsel %vm1600_vm2, %v1609_v9, 0.0 }
 0x3dd   :  { %v1611_v48 = vsel %vm1600_vm2, %v1604_v34, 0.0 }
 0x3e0   :  { %v1615_v21 = vpop.permute.xlu1 %1614 }
 0x3e1   :  { %v1621_v51 = vsel %vm1599_vm3, %v1615_v21, %v1611_v48 }
 0x3e2   :  { %1623 = vst [vmem:[%s3222_s5] sm:$0xff] %v1621_v51 }
 0x3e4   :  { %v1619_v10 = vpop.permute.xlu1 %1618 }
 0x3e5   :  { %v1622_v61 = vsel %vm1599_vm3, %v1619_v10, %v1612_v63 }
 0x3e6   :  { %1624 = vst [vmem:[%s3222_s5 + $0x8] sm:$0xf] %v1622_v61 }

</bundles_post_ra>
